<compile_context>
chip_gen: v5e
topology: v5e:2x2
jax: 0.10.0
libtpu: 0.0.40
codegen_flags: <defaults>
</compile_context>

<pallas_src>
import math
import functools

import jax
import jax.numpy as jnp
from jax import lax
from jax.experimental import pallas as pl
from jax.experimental.pallas import tpu as pltpu

NEGINF = -1e20  # neginf() in the reference


# -----------------------------------------------------------------------------
# head split / merge helpers (static lane slices + stack/concat; done once per
# tensor on bf16 data so the copies are half-width)
# -----------------------------------------------------------------------------
def _split_heads(x, n_heads, dh):
    # (L, H*dh) -> (H, L, dh); head h owns feature columns [h*dh, (h+1)*dh)
    return jnp.stack([x[:, h * dh:(h + 1) * dh] for h in range(n_heads)], axis=0)


def _merge_heads(x):
    # (H, L, dh) -> (L, H*dh) in the same head-concatenated column order
    return jnp.concatenate([x[h] for h in range(x.shape[0])], axis=-1)


# -----------------------------------------------------------------------------
# fused MHA kernel: QKV projection + batched-head attention + output projection
# grid = (B, num_q_tiles); K/V projected once per batch element (j == 0) and
# cached in VMEM scratch (K pre-transposed to (H, dh, S)).
# NOTE: correctness of the scratch caching relies on the query-tile axis being
# "arbitrary" (sequential per core, j==0 first for each batch element).
# -----------------------------------------------------------------------------
def _mha_kernel(xq_ref, xkv_ref, mask_ref,
                wq_ref, bq_ref, wkv_ref, bkv_ref, wo_ref, bo_ref,
                out_ref, k_out_ref, v_out_ref,
                k_sc, v_sc, *, n_heads, n_kchunks, kchunk):
    j = pl.program_id(1)
    H = n_heads
    tq, D = xq_ref.shape[1], xq_ref.shape[2]
    dh = D // H
    cdt = k_sc.dtype  # compute dtype for MXU operands (bf16)

    # ---- K/V projection: only at the first query tile of this batch element.
    @pl.when(j == 0)
    def _project_kv():
        xkv = xkv_ref[0]                                                 # (S, D) bf16
        kv = jnp.dot(xkv, wkv_ref[...],
                     preferred_element_type=jnp.float32) + bkv_ref[...]  # (S, 2D) f32
        kvb = kv.astype(cdt)                        # single bf16 cast, split once
        k3 = _split_heads(kvb[:, :D], H, dh)        # (H, S, dh) bf16
        v3 = _split_heads(kvb[:, D:], H, dh)        # (H, S, dh) bf16
        # incremental state written directly in (B, H, S, dh) layout, bf16
        k_out_ref[0] = k3.astype(k_out_ref.dtype)
        v_out_ref[0] = v3.astype(v_out_ref.dtype)
        v_sc[...] = v3
        # K cached pre-transposed (H, dh, S): transpose hoisted out of the
        # per-query-tile hot loop (done once per batch element).
        k_sc[...] = jnp.stack([k3[h].T for h in range(H)], axis=0)

    # ---- Q projection (1/sqrt(dh) is folded into wq/bq at init time).
    xq = xq_ref[0]                                                       # (tq, D) bf16
    q = jnp.dot(xq, wq_ref[...],
                preferred_element_type=jnp.float32) + bq_ref[...]        # f32
    q3 = _split_heads(q.astype(cdt), H, dh)                              # (H, tq, dh) bf16

    # ---- attention. mask value 0.0 means blocked (reference `mask == 0`).
    if n_kchunks == 1:
        # single-shot path (small / short S)
        blocked = mask_ref[0] == 0.0                                     # (Tm, S)
        s = jnp.einsum('hqd,hdk->hqk', q3, k_sc[...],
                       preferred_element_type=jnp.float32)               # (H, tq, S) f32
        s = jnp.where(blocked, NEGINF, s)
        m = jnp.max(s, axis=-1, keepdims=True)
        e = jnp.exp(s - m)
        denom = jnp.sum(e, axis=-1, keepdims=True)
        acc = jnp.einsum('hqk,hkd->hqd', e.astype(cdt), v_sc[...],
                         preferred_element_type=jnp.float32)             # (H, tq, dh) f32
    else:
        # chunked online softmax over S: live f32 temps bounded to H*tq*kchunk
        def body(c, carry):
            m_p, l_p, a_p = carry
            start = pl.multiple_of(c * kchunk, kchunk)
            k_c = k_sc[:, :, pl.ds(start, kchunk)]                       # (H, dh, ck)
            v_c = v_sc[:, pl.ds(start, kchunk), :]                       # (H, ck, dh)
            blk = mask_ref[0, :, pl.ds(start, kchunk)] == 0.0            # (Tm, ck)
            s = jnp.einsum('hqd,hdk->hqk', q3, k_c,
                           preferred_element_type=jnp.float32)           # (H, tq, ck)
            s = jnp.where(blk, NEGINF, s)
            m_n = jnp.maximum(m_p, jnp.max(s, axis=-1, keepdims=True))
            alpha = jnp.exp(m_p - m_n)
            e = jnp.exp(s - m_n)
            l_n = alpha * l_p + jnp.sum(e, axis=-1, keepdims=True)
            a_n = alpha * a_p + jnp.einsum('hqk,hkd->hqd', e.astype(cdt), v_c,
                                           preferred_element_type=jnp.float32)
            return m_n, l_n, a_n

        m0 = jnp.full((H, tq, 1), NEGINF, jnp.float32)
        l0 = jnp.zeros((H, tq, 1), jnp.float32)
        a0 = jnp.zeros((H, tq, dh), jnp.float32)
        _, denom, acc = lax.fori_loop(0, n_kchunks, body, (m0, l0, a0))

    # ---- deferred normalization: one multiply over (H, tq, dh) instead of
    #      (H, tq, S); reciprocal goes to the EUP slot.
    attn = acc * pl.reciprocal(denom, approx=True)

    # ---- single full-width output projection
    attn_m = _merge_heads(attn.astype(cdt))                              # (tq, D) bf16
    out = jnp.dot(attn_m, wo_ref[...],
                  preferred_element_type=jnp.float32) + bo_ref[...]
    out_ref[0] = out.astype(out_ref.dtype)


def mha_pallas(query, kv, mask, p, n_heads, *,
               compute_dtype=jnp.bfloat16, state_dtype=None,
               q_tile=None, kv_chunk=512):
    B, T, D = query.shape
    S = kv.shape[1]
    H = n_heads
    dh = D // H
    out_dtype = query.dtype
    state_dtype = compute_dtype if state_dtype is None else state_dtype

    # query-tile size: 256 on v6e/v7x (2x256^2 MXU), 128 on v5e/older.
    if q_tile is None:
        kind = jax.devices()[0].device_kind.lower()
        q_tile = 256 if any(t in kind for t in ("v6", "v7", "7x")) else 128

    # pad T to a multiple of the tile (instead of degrading to one huge tile).
    if T <= q_tile:
        tq, Tp = T, T
    else:
        tq = q_tile
        Tp = pl.cdiv(T, tq) * tq
    nT = Tp // tq

    # bf16 storage for MXU operands (halves HBM/DMA traffic); f32 accumulation.
    xq = query.astype(compute_dtype)
    xkv = kv.astype(compute_dtype)
    if Tp != T:
        xq = jnp.pad(xq, ((0, 0), (0, Tp - T), (0, 0)))

    # masks: [B, S] is broadcast in-kernel (no (B, T, S) materialization);
    # [B, T, S] is tiled along the query axis (padded rows are "allow").
    if mask.ndim == 2:
        mask3 = mask.astype(jnp.float32)[:, None, :]          # (B, 1, S)
        Tm = 1
        mask_idx = lambda b, j: (b, 0, 0)
    else:
        mask3 = mask.astype(jnp.float32)                       # (B, T, S)
        if Tp != T:
            mask3 = jnp.pad(mask3, ((0, 0), (0, Tp - T), (0, 0)), constant_values=1.0)
        Tm = tq
        mask_idx = lambda b, j: (b, j, 0)

    # chunked online softmax only when it cleanly applies (lane-aligned chunks).
    if S > kv_chunk and S % kv_chunk == 0 and kv_chunk % 128 == 0:
        n_kchunks, kchunk = S // kv_chunk, kv_chunk
    else:
        n_kchunks, kchunk = 1, S

    # ---- explicit scoped-VMEM budget sized from the resident set + headroom.
    isz = jnp.dtype(compute_dtype).itemsize
    resident = (
        2 * 4 * D * D * isz                                     # Wq|Wkv|Wo (double-buffered)
        + 2 * (tq * D + S * D) * isz                            # q tile + kv source
        + 2 * Tm * S * 4                                        # mask tile
        + 2 * tq * D * jnp.dtype(out_dtype).itemsize            # out tile
        + 2 * 2 * S * D * jnp.dtype(state_dtype).itemsize       # prev_key / prev_value
        + 2 * S * D * isz                                       # K/V VMEM scratch
        + 4 * H * tq * kchunk * 4 + 4 * tq * D * 4)             # live f32 intermediates
    try:
        cap = pltpu.get_tpu_info().vmem_capacity_bytes
    except Exception:
        cap = 64 * 1024 * 1024  # conservative (v7x per-core VMEM)
    want = max(32 * 1024 * 1024, int(1.5 * resident) + (8 << 20))
    vmem_limit = max(16 * 1024 * 1024, int(min(want, cap - (8 << 20))))

    const2 = lambda b, j: (0, 0)
    # NOTE: the constant-index weight specs are still double-buffered by Pallas;
    # pipeline_mode=pl.Buffered(1) would halve that fixed VMEM cost (important
    # for D>=2048 on v7x) once supported by the installed lowering.
    # NOTE: on v7x with small B, a leading 2-wide "parallel" axis splitting the
    # query tiles per core (each core doing its own first-tile K/V projection)
    # would keep both TensorCores busy.
    kernel = functools.partial(_mha_kernel, n_heads=H,
                               n_kchunks=n_kchunks, kchunk=kchunk)

    out, k4, v4 = pl.pallas_call(
        kernel,
        out_shape=(jax.ShapeDtypeStruct((B, Tp, D), out_dtype),
                   jax.ShapeDtypeStruct((B, H, S, dh), state_dtype),   # prev_key
                   jax.ShapeDtypeStruct((B, H, S, dh), state_dtype)),  # prev_value
        grid=(B, nT),
        in_specs=[
            pl.BlockSpec((1, tq, D), lambda b, j: (b, j, 0)),        # query tile
            pl.BlockSpec((1, S, D), lambda b, j: (b, 0, 0)),         # key/value source
            pl.BlockSpec((1, Tm, S), mask_idx),                      # mask
            pl.BlockSpec((D, D), const2), pl.BlockSpec((1, D), const2),          # Wq, bq
            pl.BlockSpec((D, 2 * D), const2), pl.BlockSpec((1, 2 * D), const2),  # Wkv, bkv
            pl.BlockSpec((D, D), const2), pl.BlockSpec((1, D), const2),          # Wo, bo
        ],
        out_specs=(pl.BlockSpec((1, tq, D), lambda b, j: (b, j, 0)),
                   pl.BlockSpec((1, H, S, dh), lambda b, j: (b, 0, 0, 0)),
                   pl.BlockSpec((1, H, S, dh), lambda b, j: (b, 0, 0, 0))),
        scratch_shapes=[pltpu.VMEM((H, dh, S), compute_dtype),       # K^T heads
                        pltpu.VMEM((H, S, dh), compute_dtype)],      # V heads
        compiler_params=pltpu.CompilerParams(
            dimension_semantics=("parallel", "arbitrary"),
            vmem_limit_bytes=vmem_limit),
    )(xq, xkv, mask3, p["wq"], p["bq"], p["wkv"], p["bkv"], p["wo"], p["bo"])

    if Tp != T:
        out = out[:, :T]
    return out, k4, v4


# -----------------------------------------------------------------------------
# module-level forward: mirrors MultiHeadAttention.forward (dropout=0)
# -----------------------------------------------------------------------------
def multi_head_attention(params, n_heads, query, key=None, value=None, mask=None,
                         incr_state=None, static_kv=False,
                         compute_dtype=jnp.bfloat16):
    assert mask is not None, "Mask is None, please specify a mask"
    # TODO(synk): incr_state / static_kv cached-decoding path (prev_key /
    # prev_value / prev_mask concatenation) is not implemented; this covers the
    # incr_state=None forward exactly.
    if key is None and value is None:
        key = value = query
    elif value is None:
        value = key
    assert value is key, "fused K|V projection expects value is key (reference usage)"

    out, k4, v4 = mha_pallas(query, key, mask, params, n_heads,
                             compute_dtype=compute_dtype)
    new_incr_state = {"prev_key": k4, "prev_value": v4, "prev_mask": mask}
    return out, new_incr_state


# -----------------------------------------------------------------------------
# deterministic parameter init (shapes/init from the module's __init__);
# K and V weights fused into one (D, 2D) matrix; attention scale folded into Wq/bq.
# -----------------------------------------------------------------------------
def init_mha_params(key, dim, n_heads, compute_dtype=jnp.bfloat16):
    def linear(k, fan_in, fan_out):
        kw, kb = jax.random.split(k)
        std = math.sqrt(2.0 / (fan_in + fan_out))      # xavier normal
        w = jax.random.normal(kw, (fan_in, fan_out), jnp.float32) * std
        b = jax.random.normal(kb, (1, fan_out), jnp.float32) * 0.01
        return w, b

    kq, kk, kv, ko = jax.random.split(key, 4)
    wq, bq = linear(kq, dim, dim)
    wk, bk = linear(kk, dim, dim)
    wv, bv = linear(kv, dim, dim)
    wo, bo = linear(ko, dim, dim)
    # fold q.div_(sqrt(dim_per_head)) into the Q projection (one-time host transform)
    inv_scale = 1.0 / math.sqrt(dim // n_heads)
    wq = wq * inv_scale
    bq = bq * inv_scale
    return {
        "wq": wq.astype(compute_dtype), "bq": bq,
        "wkv": jnp.concatenate([wk, wv], axis=1).astype(compute_dtype),
        "bkv": jnp.concatenate([bk, bv], axis=1),
        "wo": wo.astype(compute_dtype), "bo": bo,
    }


# -----------------------------------------------------------------------------
# pure-JAX reference (mirrors the kernel's bf16 rounding points) for sanity check
# -----------------------------------------------------------------------------
def mha_reference(params, n_heads, query, key_val, mask):
    r = lambda a: a.astype(jnp.bfloat16).astype(jnp.float32)
    B, T, D = query.shape
    S = key_val.shape[1]
    H = n_heads
    dh = D // H
    wq = params["wq"].astype(jnp.float32)
    wkv = params["wkv"].astype(jnp.float32)
    wo = params["wo"].astype(jnp.float32)
    q = r(query) @ wq + params["bq"]                 # scale pre-folded into wq/bq
    kv = r(key_val) @ wkv + params["bkv"]
    k, v = r(kv[..., :D]), r(kv[..., D:])
    qh = r(q).reshape(B, T, H, dh).transpose(0, 2, 1, 3)
    kh = k.reshape(B, S, H, dh).transpose(0, 2, 1, 3)
    vh = v.reshape(B, S, H, dh).transpose(0, 2, 1, 3)
    s = jnp.einsum("bhtd,bhsd->bhts", qh, kh)
    blocked = (mask == 0.0)
    blocked = blocked[:, None, None, :] if mask.ndim == 2 else blocked[:, None, :, :]
    s = jnp.where(blocked, NEGINF, s)
    p = jax.nn.softmax(s, axis=-1)
    attn = jnp.einsum("bhts,bhsd->bhtd", r(p), vh)
    attn_m = r(attn).transpose(0, 2, 1, 3).reshape(B, T, D)
    return attn_m @ wo + params["bo"]


if __name__ == "__main__":
    # small, lane-aligned shapes: dh = D / H = 128 keeps MXU operands lane-dense.
    B, T, S, D, H = 2, 8, 8, 256, 2
    dh = D // H

    key = jax.random.PRNGKey(0)
    k_params, k_x, k_enc, k_xl, k_el = jax.random.split(key, 5)

    params = init_mha_params(k_params, D, H)
    x = jax.random.normal(k_x, (B, T, D), jnp.float32)
    encoder_output = jax.random.normal(k_enc, (B, S, D), jnp.float32)

    def check(out, ref, tag):
        err = float(jnp.max(jnp.abs(out - ref)))
        bound = 0.05 * (1.0 + float(jnp.max(jnp.abs(ref))))
        assert err < bound, f"{tag}: max abs err {err} >= {bound}"

    # 1) decoder self-attention: [B, T, T] causal mask (0.0 == blocked)
    dec_mask = jnp.broadcast_to(jnp.tril(jnp.ones((T, T), jnp.float32))[None], (B, T, T))
    out_sa, st_sa = multi_head_attention(params, H, x, mask=dec_mask)
    jax.block_until_ready(out_sa)
    check(out_sa, mha_reference(params, H, x, x, dec_mask), "self-attn")
    assert out_sa.shape == (B, T, D)
    assert st_sa["prev_key"].shape == (B, H, T, dh)
    assert st_sa["prev_value"].shape == (B, H, T, dh)

    # 2) encoder/decoder attention: [B, S] mask, last encoder token blocked
    enc_mask = jnp.ones((B, S), jnp.float32).at[:, -1].set(0.0)
    out_ea, st_ea = multi_head_attention(params, H, x, key=encoder_output, mask=enc_mask)
    jax.block_until_ready(out_ea)
    check(out_ea, mha_reference(params, H, x, encoder_output, enc_mask), "enc/dec-attn")
    assert out_ea.shape == (B, T, D)
    assert st_ea["prev_key"].shape == (B, H, S, dh)

    # 3) longer sequences: exercises query-length padding, multi-tile K/V scratch
    #    reuse and the chunked online-softmax path (S % 512 == 0, S > 512).
    Bl, Tl, Sl = 1, 300, 1024
    xl = jax.random.normal(k_xl, (Bl, Tl, D), jnp.float32)
    encl = jax.random.normal(k_el, (Bl, Sl, D), jnp.float32)
    lmask = jnp.ones((Bl, Sl), jnp.float32).at[:, 1000:].set(0.0)
    out_l, st_l = multi_head_attention(params, H, xl, key=encl, mask=lmask)
    jax.block_until_ready(out_l)
    check(out_l, mha_reference(params, H, xl, encl, lmask), "long enc/dec-attn")
    assert out_l.shape == (Bl, Tl, D)
    assert st_l["prev_key"].shape == (Bl, H, Sl, dh)

    assert bool(jnp.isfinite(out_sa).all())
    assert bool(jnp.isfinite(out_ea).all())
    assert bool(jnp.isfinite(out_l).all())
    print("KERNEL_OK")
</pallas_src>

<mosaic_0001>
module attributes {stable_mosaic.version = 11 : i64} {
  func.func @_mha_kernel(%arg0: i32, %arg1: i32, %arg2: memref<1x8x256xbf16, #tpu.memory_space<vmem>>, %arg3: memref<1x8x256xbf16, #tpu.memory_space<vmem>>, %arg4: memref<1x8x8xf32, #tpu.memory_space<vmem>>, %arg5: memref<256x256xbf16, #tpu.memory_space<vmem>>, %arg6: memref<1x256xf32, #tpu.memory_space<vmem>>, %arg7: memref<256x512xbf16, #tpu.memory_space<vmem>>, %arg8: memref<1x512xf32, #tpu.memory_space<vmem>>, %arg9: memref<256x256xbf16, #tpu.memory_space<vmem>>, %arg10: memref<1x256xf32, #tpu.memory_space<vmem>>, %arg11: memref<1x8x256xf32, #tpu.memory_space<vmem>>, %arg12: memref<1x2x8x128xbf16, #tpu.memory_space<vmem>>, %arg13: memref<1x2x8x128xbf16, #tpu.memory_space<vmem>>, %arg14: memref<2x128x8xbf16, #tpu.memory_space<vmem>>, %arg15: memref<2x8x128xbf16, #tpu.memory_space<vmem>>) attributes {dimension_semantics = [#tpu.dimension_semantics<parallel>, #tpu.dimension_semantics<arbitrary>], iteration_bounds = array<i64: 2, 1>, scalar_prefetch = 0 : i64, scratch_operands = 2 : i64, tpu.core_type = #tpu.core_type<tc>, window_params = [{transform_indices = @transform_0, window_bounds = array<i64: 1, 8, 256>}, {transform_indices = @transform_1, window_bounds = array<i64: 1, 8, 256>}, {transform_indices = @transform_2, window_bounds = array<i64: 1, 8, 8>}, {pipeline_mode = #tpu.pipeline_mode<synchronous>, transform_indices = @transform_3, window_bounds = array<i64: 256, 256>}, {pipeline_mode = #tpu.pipeline_mode<synchronous>, transform_indices = @transform_4, window_bounds = array<i64: 1, 256>}, {pipeline_mode = #tpu.pipeline_mode<synchronous>, transform_indices = @transform_5, window_bounds = array<i64: 256, 512>}, {pipeline_mode = #tpu.pipeline_mode<synchronous>, transform_indices = @transform_6, window_bounds = array<i64: 1, 512>}, {pipeline_mode = #tpu.pipeline_mode<synchronous>, transform_indices = @transform_7, window_bounds = array<i64: 256, 256>}, {pipeline_mode = #tpu.pipeline_mode<synchronous>, transform_indices = @transform_8, window_bounds = array<i64: 1, 256>}, {transform_indices = @transform_9, window_bounds = array<i64: 1, 8, 256>}, {transform_indices = @transform_10, window_bounds = array<i64: 1, 2, 8, 128>}, {transform_indices = @transform_11, window_bounds = array<i64: 1, 2, 8, 128>}]} {
    %c0_i32 = arith.constant 0 : i32
    %0 = arith.cmpi eq, %arg1, %c0_i32 : i32
    %1 = arith.extui %0 : i1 to i32
    %c0_i32_0 = arith.constant 0 : i32
    %2 = arith.cmpi ne, %1, %c0_i32_0 : i32
    scf.if %2 {
      %c0_30 = arith.constant 0 : index
      %c0_31 = arith.constant 0 : index
      %c0_32 = arith.constant 0 : index
      %53 = vector.load %arg3[%c0_30, %c0_31, %c0_32] : memref<1x8x256xbf16, #tpu.memory_space<vmem>>, vector<1x8x256xbf16>
      %54 = vector.shape_cast %53 : vector<1x8x256xbf16> to vector<8x256xbf16>
      %c0_33 = arith.constant 0 : index
      %c0_34 = arith.constant 0 : index
      %55 = vector.load %arg7[%c0_33, %c0_34] : memref<256x512xbf16, #tpu.memory_space<vmem>>, vector<256x512xbf16>
      %cst_35 = arith.constant dense<0.000000e+00> : vector<8x512xf32>
      %56 = tpu.matmul %54, %55, %cst_35 {dimension_numbers = #tpu.dot_dimension_numbers<[1], [0], [0], [1], [0, 0, 1, 1], [], []>} : vector<8x256xbf16>, vector<256x512xbf16>, vector<8x512xf32> -> vector<8x512xf32>
      %c0_36 = arith.constant 0 : index
      %c0_37 = arith.constant 0 : index
      %57 = vector.load %arg8[%c0_36, %c0_37] : memref<1x512xf32, #tpu.memory_space<vmem>>, vector<1x512xf32>
      %58 = vector.broadcast %57 : vector<1x512xf32> to vector<8x512xf32>
      %59 = arith.addf %56, %58 : vector<8x512xf32>
      %60 = arith.truncf %59 : vector<8x512xf32> to vector<8x512xbf16>
      %61 = vector.extract_strided_slice %60 {offsets = [0, 0], sizes = [8, 256], strides = [1, 1]} : vector<8x512xbf16> to vector<8x256xbf16>
      %62 = vector.extract_strided_slice %61 {offsets = [0, 0], sizes = [8, 128], strides = [1, 1]} : vector<8x256xbf16> to vector<8x128xbf16>
      %63 = vector.extract_strided_slice %61 {offsets = [0, 128], sizes = [8, 128], strides = [1, 1]} : vector<8x256xbf16> to vector<8x128xbf16>
      %64 = vector.shape_cast %62 : vector<8x128xbf16> to vector<1x8x128xbf16>
      %65 = vector.shape_cast %63 : vector<8x128xbf16> to vector<1x8x128xbf16>
      %66 = tpu.concatenate %64, %65 in 0 : vector<1x8x128xbf16>, vector<1x8x128xbf16> -> vector<2x8x128xbf16>
      %67 = vector.extract_strided_slice %60 {offsets = [0, 256], sizes = [8, 256], strides = [1, 1]} : vector<8x512xbf16> to vector<8x256xbf16>
      %68 = vector.extract_strided_slice %67 {offsets = [0, 0], sizes = [8, 128], strides = [1, 1]} : vector<8x256xbf16> to vector<8x128xbf16>
      %69 = vector.extract_strided_slice %67 {offsets = [0, 128], sizes = [8, 128], strides = [1, 1]} : vector<8x256xbf16> to vector<8x128xbf16>
      %70 = vector.shape_cast %68 : vector<8x128xbf16> to vector<1x8x128xbf16>
      %71 = vector.shape_cast %69 : vector<8x128xbf16> to vector<1x8x128xbf16>
      %72 = tpu.concatenate %70, %71 in 0 : vector<1x8x128xbf16>, vector<1x8x128xbf16> -> vector<2x8x128xbf16>
      %c0_38 = arith.constant 0 : index
      %c0_39 = arith.constant 0 : index
      %c0_40 = arith.constant 0 : index
      %c0_41 = arith.constant 0 : index
      %73 = vector.load %arg12[%c0_38, %c0_39, %c0_40, %c0_41] : memref<1x2x8x128xbf16, #tpu.memory_space<vmem>>, vector<1x2x8x128xbf16>
      %74 = vector.shape_cast %73 : vector<1x2x8x128xbf16> to vector<2x8x128xbf16>
      %75 = vector.shape_cast %66 : vector<2x8x128xbf16> to vector<1x2x8x128xbf16>
      tpu.vector_store %arg12[%c0_38, %c0_39, %c0_40, %c0_41], %75 {strides = array<i32>} : memref<1x2x8x128xbf16, #tpu.memory_space<vmem>>, vector<1x2x8x128xbf16>,
      %c0_42 = arith.constant 0 : index
      %c0_43 = arith.constant 0 : index
      %c0_44 = arith.constant 0 : index
      %c0_45 = arith.constant 0 : index
      %76 = vector.load %arg13[%c0_42, %c0_43, %c0_44, %c0_45] : memref<1x2x8x128xbf16, #tpu.memory_space<vmem>>, vector<1x2x8x128xbf16>
      %77 = vector.shape_cast %76 : vector<1x2x8x128xbf16> to vector<2x8x128xbf16>
      %78 = vector.shape_cast %72 : vector<2x8x128xbf16> to vector<1x2x8x128xbf16>
      tpu.vector_store %arg13[%c0_42, %c0_43, %c0_44, %c0_45], %78 {strides = array<i32>} : memref<1x2x8x128xbf16, #tpu.memory_space<vmem>>, vector<1x2x8x128xbf16>,
      %c0_46 = arith.constant 0 : index
      %c0_47 = arith.constant 0 : index
      %c0_48 = arith.constant 0 : index
      %79 = vector.load %arg15[%c0_46, %c0_47, %c0_48] : memref<2x8x128xbf16, #tpu.memory_space<vmem>>, vector<2x8x128xbf16>
      tpu.vector_store %arg15[%c0_46, %c0_47, %c0_48], %72 {strides = array<i32>} : memref<2x8x128xbf16, #tpu.memory_space<vmem>>, vector<2x8x128xbf16>,
      %80 = vector.extract_strided_slice %66 {offsets = [0, 0, 0], sizes = [1, 8, 128], strides = [1, 1, 1]} : vector<2x8x128xbf16> to vector<1x8x128xbf16>
      %81 = vector.shape_cast %80 : vector<1x8x128xbf16> to vector<8x128xbf16>
      %82 = tpu.transpose %81, [1, 0] : vector<8x128xbf16> -> vector<128x8xbf16>
      %83 = vector.extract_strided_slice %66 {offsets = [1, 0, 0], sizes = [1, 8, 128], strides = [1, 1, 1]} : vector<2x8x128xbf16> to vector<1x8x128xbf16>
      %84 = vector.shape_cast %83 : vector<1x8x128xbf16> to vector<8x128xbf16>
      %85 = tpu.transpose %84, [1, 0] : vector<8x128xbf16> -> vector<128x8xbf16>
      %86 = vector.shape_cast %82 : vector<128x8xbf16> to vector<1x128x8xbf16>
      %87 = vector.shape_cast %85 : vector<128x8xbf16> to vector<1x128x8xbf16>
      %88 = tpu.concatenate %86, %87 in 0 : vector<1x128x8xbf16>, vector<1x128x8xbf16> -> vector<2x128x8xbf16>
      %c0_49 = arith.constant 0 : index
      %c0_50 = arith.constant 0 : index
      %c0_51 = arith.constant 0 : index
      %89 = vector.load %arg14[%c0_49, %c0_50, %c0_51] : memref<2x128x8xbf16, #tpu.memory_space<vmem>>, vector<2x128x8xbf16>
      tpu.vector_store %arg14[%c0_49, %c0_50, %c0_51], %88 {strides = array<i32>} : memref<2x128x8xbf16, #tpu.memory_space<vmem>>, vector<2x128x8xbf16>,
    } else {
    }
    %c0 = arith.constant 0 : index
    %c0_1 = arith.constant 0 : index
    %c0_2 = arith.constant 0 : index
    %3 = vector.load %arg2[%c0, %c0_1, %c0_2] : memref<1x8x256xbf16, #tpu.memory_space<vmem>>, vector<1x8x256xbf16>
    %4 = vector.shape_cast %3 : vector<1x8x256xbf16> to vector<8x256xbf16>
    %c0_3 = arith.constant 0 : index
    %c0_4 = arith.constant 0 : index
    %5 = vector.load %arg5[%c0_3, %c0_4] : memref<256x256xbf16, #tpu.memory_space<vmem>>, vector<256x256xbf16>
    %cst = arith.constant dense<0.000000e+00> : vector<8x256xf32>
    %6 = tpu.matmul %4, %5, %cst {dimension_numbers = #tpu.dot_dimension_numbers<[1], [0], [0], [1], [0, 0, 1, 1], [], []>} : vector<8x256xbf16>, vector<256x256xbf16>, vector<8x256xf32> -> vector<8x256xf32>
    %c0_5 = arith.constant 0 : index
    %c0_6 = arith.constant 0 : index
    %7 = vector.load %arg6[%c0_5, %c0_6] : memref<1x256xf32, #tpu.memory_space<vmem>>, vector<1x256xf32>
    %8 = vector.broadcast %7 : vector<1x256xf32> to vector<8x256xf32>
    %9 = arith.addf %6, %8 : vector<8x256xf32>
    %10 = arith.truncf %9 : vector<8x256xf32> to vector<8x256xbf16>
    %11 = vector.extract_strided_slice %10 {offsets = [0, 0], sizes = [8, 128], strides = [1, 1]} : vector<8x256xbf16> to vector<8x128xbf16>
    %12 = vector.extract_strided_slice %10 {offsets = [0, 128], sizes = [8, 128], strides = [1, 1]} : vector<8x256xbf16> to vector<8x128xbf16>
    %13 = vector.shape_cast %11 : vector<8x128xbf16> to vector<1x8x128xbf16>
    %14 = vector.shape_cast %12 : vector<8x128xbf16> to vector<1x8x128xbf16>
    %15 = tpu.concatenate %13, %14 in 0 : vector<1x8x128xbf16>, vector<1x8x128xbf16> -> vector<2x8x128xbf16>
    %c0_7 = arith.constant 0 : index
    %c0_8 = arith.constant 0 : index
    %c0_9 = arith.constant 0 : index
    %16 = vector.load %arg4[%c0_7, %c0_8, %c0_9] : memref<1x8x8xf32, #tpu.memory_space<vmem>>, vector<1x8x8xf32>
    %17 = vector.shape_cast %16 : vector<1x8x8xf32> to vector<8x8xf32>
    %cst_10 = arith.constant 0.000000e+00 : f32
    %18 = vector.broadcast %cst_10 : f32 to vector<8x8xf32>
    %19 = arith.cmpf oeq, %17, %18 : vector<8x8xf32>
    %c0_11 = arith.constant 0 : index
    %c0_12 = arith.constant 0 : index
    %c0_13 = arith.constant 0 : index
    %20 = vector.load %arg14[%c0_11, %c0_12, %c0_13] : memref<2x128x8xbf16, #tpu.memory_space<vmem>>, vector<2x128x8xbf16>
    "tpu.trace_start"() <{level = 10 : i32, message = "hqd,hdk->hqk"}> : () -> ()
    %cst_14 = arith.constant dense<0.000000e+00> : vector<2x8x8xf32>
    %21 = tpu.matmul %15, %20, %cst_14 {dimension_numbers = #tpu.dot_dimension_numbers<[2], [1], [1], [2], [0, 0, 0, 1, 1, 2], [0], [0]>} : vector<2x8x128xbf16>, vector<2x128x8xbf16>, vector<2x8x8xf32> -> vector<2x8x8xf32>
    %cst_15 = arith.constant -1.000000e+20 : f32
    "tpu.trace_stop"() : () -> ()
    %22 = vector.shape_cast %19 : vector<8x8xi1> to vector<1x8x8xi1>
    %23 = vector.broadcast %22 : vector<1x8x8xi1> to vector<2x8x8xi1>
    %24 = vector.broadcast %cst_15 : f32 to vector<2x8x8xf32>
    %25 = arith.select %23, %24, %21 : vector<2x8x8xi1>, vector<2x8x8xf32>
    %cst_16 = arith.constant dense<0xFF800000> : vector<2x8xf32>
    %26 = vector.multi_reduction <maximumf>, %25, %cst_16 [2] : vector<2x8x8xf32> to vector<2x8xf32>
    %27 = vector.shape_cast %26 : vector<2x8xf32> to vector<2x8x1xf32>
    %28 = vector.broadcast %27 : vector<2x8x1xf32> to vector<2x8x8xf32>
    %29 = arith.subf %25, %28 : vector<2x8x8xf32>
    %30 = math.exp %29 : vector<2x8x8xf32>
    %cst_17 = arith.constant dense<0.000000e+00> : vector<2x8xf32>
    %31 = vector.multi_reduction <add>, %30, %cst_17 [2] : vector<2x8x8xf32> to vector<2x8xf32>
    %32 = vector.shape_cast %31 : vector<2x8xf32> to vector<2x8x1xf32>
    %33 = arith.truncf %30 : vector<2x8x8xf32> to vector<2x8x8xbf16>
    %c0_18 = arith.constant 0 : index
    %c0_19 = arith.constant 0 : index
    %c0_20 = arith.constant 0 : index
    %34 = vector.load %arg15[%c0_18, %c0_19, %c0_20] : memref<2x8x128xbf16, #tpu.memory_space<vmem>>, vector<2x8x128xbf16>
    "tpu.trace_start"() <{level = 10 : i32, message = "hqk,hkd->hqd"}> : () -> ()
    %cst_21 = arith.constant dense<0.000000e+00> : vector<2x8x128xf32>
    %35 = tpu.matmul %33, %34, %cst_21 {dimension_numbers = #tpu.dot_dimension_numbers<[2], [1], [1], [2], [0, 0, 0, 1, 1, 2], [0], [0]>} : vector<2x8x8xbf16>, vector<2x8x128xbf16>, vector<2x8x128xf32> -> vector<2x8x128xf32>
    "tpu.trace_stop"() : () -> ()
    %36 = tpu.reciprocal %32 {approx = true} : vector<2x8x1xf32> -> vector<2x8x1xf32>
    %37 = vector.broadcast %36 : vector<2x8x1xf32> to vector<2x8x128xf32>
    %38 = arith.mulf %35, %37 : vector<2x8x128xf32>
    %39 = arith.truncf %38 : vector<2x8x128xf32> to vector<2x8x128xbf16>
    %40 = vector.extract_strided_slice %39 {offsets = [0, 0, 0], sizes = [1, 8, 128], strides = [1, 1, 1]} : vector<2x8x128xbf16> to vector<1x8x128xbf16>
    %41 = vector.shape_cast %40 : vector<1x8x128xbf16> to vector<8x128xbf16>
    %42 = vector.extract_strided_slice %39 {offsets = [1, 0, 0], sizes = [1, 8, 128], strides = [1, 1, 1]} : vector<2x8x128xbf16> to vector<1x8x128xbf16>
    %43 = vector.shape_cast %42 : vector<1x8x128xbf16> to vector<8x128xbf16>
    %44 = tpu.concatenate %41, %43 in 1 : vector<8x128xbf16>, vector<8x128xbf16> -> vector<8x256xbf16>
    %c0_22 = arith.constant 0 : index
    %c0_23 = arith.constant 0 : index
    %45 = vector.load %arg9[%c0_22, %c0_23] : memref<256x256xbf16, #tpu.memory_space<vmem>>, vector<256x256xbf16>
    %cst_24 = arith.constant dense<0.000000e+00> : vector<8x256xf32>
    %46 = tpu.matmul %44, %45, %cst_24 {dimension_numbers = #tpu.dot_dimension_numbers<[1], [0], [0], [1], [0, 0, 1, 1], [], []>} : vector<8x256xbf16>, vector<256x256xbf16>, vector<8x256xf32> -> vector<8x256xf32>
    %c0_25 = arith.constant 0 : index
    %c0_26 = arith.constant 0 : index
    %47 = vector.load %arg10[%c0_25, %c0_26] : memref<1x256xf32, #tpu.memory_space<vmem>>, vector<1x256xf32>
    %48 = vector.broadcast %47 : vector<1x256xf32> to vector<8x256xf32>
    %49 = arith.addf %46, %48 : vector<8x256xf32>
    %c0_27 = arith.constant 0 : index
    %c0_28 = arith.constant 0 : index
    %c0_29 = arith.constant 0 : index
    %50 = vector.load %arg11[%c0_27, %c0_28, %c0_29] : memref<1x8x256xf32, #tpu.memory_space<vmem>>, vector<1x8x256xf32>
    %51 = vector.shape_cast %50 : vector<1x8x256xf32> to vector<8x256xf32>
    %52 = vector.shape_cast %49 : vector<8x256xf32> to vector<1x8x256xf32>
    tpu.vector_store %arg11[%c0_27, %c0_28, %c0_29], %52 {strides = array<i32>} : memref<1x8x256xf32, #tpu.memory_space<vmem>>, vector<1x8x256xf32>,
    return
  }
  func.func @transform_0(%arg0: i32, %arg1: i32) -> (i32, i32, i32) {
    %c0_i32 = arith.constant 0 : i32
    %c0_i32_0 = arith.constant 0 : i32
    return %arg0, %arg1, %c0_i32 : i32, i32, i32
  }
  func.func @transform_1(%arg0: i32, %arg1: i32) -> (i32, i32, i32) {
    %c0_i32 = arith.constant 0 : i32
    %c0_i32_0 = arith.constant 0 : i32
    %c0_i32_1 = arith.constant 0 : i32
    return %arg0, %c0_i32, %c0_i32_0 : i32, i32, i32
  }
  func.func @transform_2(%arg0: i32, %arg1: i32) -> (i32, i32, i32) {
    %c0_i32 = arith.constant 0 : i32
    %c0_i32_0 = arith.constant 0 : i32
    return %arg0, %arg1, %c0_i32 : i32, i32, i32
  }
  func.func @transform_3(%arg0: i32, %arg1: i32) -> (i32, i32) {
    %c0_i32 = arith.constant 0 : i32
    %c0_i32_0 = arith.constant 0 : i32
    %c0_i32_1 = arith.constant 0 : i32
    return %c0_i32, %c0_i32_0 : i32, i32
  }
  func.func @transform_4(%arg0: i32, %arg1: i32) -> (i32, i32) {
    %c0_i32 = arith.constant 0 : i32
    %c0_i32_0 = arith.constant 0 : i32
    %c0_i32_1 = arith.constant 0 : i32
    return %c0_i32, %c0_i32_0 : i32, i32
  }
  func.func @transform_5(%arg0: i32, %arg1: i32) -> (i32, i32) {
    %c0_i32 = arith.constant 0 : i32
    %c0_i32_0 = arith.constant 0 : i32
    %c0_i32_1 = arith.constant 0 : i32
    return %c0_i32, %c0_i32_0 : i32, i32
  }
  func.func @transform_6(%arg0: i32, %arg1: i32) -> (i32, i32) {
    %c0_i32 = arith.constant 0 : i32
    %c0_i32_0 = arith.constant 0 : i32
    %c0_i32_1 = arith.constant 0 : i32
    return %c0_i32, %c0_i32_0 : i32, i32
  }
  func.func @transform_7(%arg0: i32, %arg1: i32) -> (i32, i32) {
    %c0_i32 = arith.constant 0 : i32
    %c0_i32_0 = arith.constant 0 : i32
    %c0_i32_1 = arith.constant 0 : i32
    return %c0_i32, %c0_i32_0 : i32, i32
  }
  func.func @transform_8(%arg0: i32, %arg1: i32) -> (i32, i32) {
    %c0_i32 = arith.constant 0 : i32
    %c0_i32_0 = arith.constant 0 : i32
    %c0_i32_1 = arith.constant 0 : i32
    return %c0_i32, %c0_i32_0 : i32, i32
  }
  func.func @transform_9(%arg0: i32, %arg1: i32) -> (i32, i32, i32) {
    %c0_i32 = arith.constant 0 : i32
    %c0_i32_0 = arith.constant 0 : i32
    return %arg0, %arg1, %c0_i32 : i32, i32, i32
  }
  func.func @transform_10(%arg0: i32, %arg1: i32) -> (i32, i32, i32, i32) {
    %c0_i32 = arith.constant 0 : i32
    %c0_i32_0 = arith.constant 0 : i32
    %c0_i32_1 = arith.constant 0 : i32
    %c0_i32_2 = arith.constant 0 : i32
    return %arg0, %c0_i32, %c0_i32_0, %c0_i32_1 : i32, i32, i32, i32
  }
  func.func @transform_11(%arg0: i32, %arg1: i32) -> (i32, i32, i32, i32) {
    %c0_i32 = arith.constant 0 : i32
    %c0_i32_0 = arith.constant 0 : i32
    %c0_i32_1 = arith.constant 0 : i32
    %c0_i32_2 = arith.constant 0 : i32
    return %arg0, %c0_i32, %c0_i32_0, %c0_i32_1 : i32, i32, i32, i32
  }
}

</mosaic_0001>

<bundles_post_ra>
// kernel: tpu_custom_call.1
= control target key start
LH: loop header
LB: loop body
LE: loop exit
PB: predicated region body
PF: predicated region fallthrough
CT: control target
= control target key end

     0   :  { %s4011_s0 = inlined_call_operand.hbm [shape: bf16[2,8,256], index: 0, kind: input, shape index: {}]   ;;  %s4012_s1 = inlined_call_operand.hbm [shape: bf16[2,8,256], index: 1, kind: input, shape index: {}]   ;;  %s4013_s2 = inlined_call_operand.hbm [shape: f32[2,8,8], index: 2, kind: input, shape index: {}]   ;;  %s4014_s3 = inlined_call_operand.hbm [shape: bf16[256,256], index: 3, kind: input, shape index: {}]   ;;  %s4015_s4 = inlined_call_operand.hbm [shape: f32[1,256], index: 4, kind: input, shape index: {}]   ;;  %s4016_s5 = inlined_call_operand.hbm [shape: bf16[256,512], index: 5, kind: input, shape index: {}]   ;;  %s4017_s6 = inlined_call_operand.vmem [shape: f32[1,512], index: 6, kind: input, shape index: {}]   ;;  %s4018_s7 = inlined_call_operand.hbm [shape: bf16[256,256], index: 7, kind: input, shape index: {}]   ;;  %s4019_s8 = inlined_call_operand.vmem [shape: f32[1,256], index: 8, kind: input, shape index: {}]   ;;  %s4020_s9 = inlined_call_operand.hbm [shape: f32[2,8,256], index: 9, kind: output, shape index: {0}]   ;;  %s4021_s10 = inlined_call_operand.hbm [shape: bf16[2,2,8,128], index: 10, kind: output, shape index: {1}]   ;;  %s4022_s11 = inlined_call_operand.hbm [shape: bf16[2,2,8,128], index: 11, kind: output, shape index: {2}]  }
   0x1   :  { %4034 = sst [smem:[#allocation32_spill]] %s4011_s0 }
   0x2   :  { %4035 = sst [smem:[#allocation33_spill]] %s4012_s1 }
   0x3   :  { %4036 = sst [smem:[#allocation34_spill]] %s4014_s3 }
   0x4   :  { %4037 = sst [smem:[#allocation35_spill]] %s4015_s4 }
   0x5   :  { %4038 = sst [smem:[#allocation36_spill]] %s4016_s5 }
   0x6   :  { %4039 = sst [smem:[#allocation37_spill]] %s4018_s7 }
   0x7   :  { %4040 = sst [smem:[#allocation38_spill]] %s4019_s8 }
   0x8   :  { %4041 = sst [smem:[#allocation39_spill]] %s4020_s9 }
   0x9   :  { %17 = vsyncpa [#allocation5], 0 }
   0xa   :  { %19 = vsyncpa [#allocation5 + $0x1], 0 }
   0xb   :  { %20 = vsyncpa [#allocation8], 0 }
   0xc   :  { %22 = vsyncpa [#allocation8 + $0x1], 0 }
   0xd   :  { %23 = vsyncpa [#allocation11], 0 }
   0xe   :  { %24 = vsyncpa [#allocation14], 0 }
   0xf   :  { %25 = vsyncpa [#allocation6], 0 }
  0x10   :  { %27 = vsyncpa [#allocation6 + $0x1], 0 }
  0x11   :  { %28 = vsyncpa [#allocation18], 0 }
  0x12   :  { %30 = vsyncpa [#allocation18 + $0x1], 0  ;;  %s3676_s17 = smov 0   ;;  %s3678_s18 = smov 0  }
  0x13   :  { %s3680_s19 = smov 0   ;;  %s3682_s20 = smov 0  }
  0x14   :  { %s3684_s21 = smov 0   ;;  %s3686_s22 = smov 0  }
  0x15 LB: > { %4042 = sst [smem:[#allocation26_spill]] %s3584_s17  ;;  %s3707_s23 = sadd.s32 4294967295, %s3604_s22   ;;  %s3604_s22 = sphi %s3686_s22, %s36_s22   ;;  %s3600_s21 = sphi %s3684_s21, %s4072_s21   ;;  %s3596_s20 = sphi %s3682_s20, %s4071_s20   ;;  %s3592_s19 = sphi %s3680_s19, %s4075_s19   ;;  %s3588_s18 = sphi %s3678_s18, %s4074_s18   ;;  %s3584_s17 = sphi %s3676_s17, %s4073_s17  }
  0x16   : > { %4043 = sst [smem:[#allocation27_spill]] %s3600_s21  ;;  %p2322_p0 = scmp.ge.s32.totalorder %s3604_s22, 1 }
  0x17   : > { %4044 = sst [smem:[#allocation28_spill]] %s3604_s22  ;;  %p71_p1 = scmp.eq.s32.totalorder %s3707_s23, 0 }
  0x18   : > { %p341_p2 = scmp.lt.s32.totalorder %s3604_s22, 3  ;;  %s4045_s3 = sld [smem:[#allocation34_spill]] }
  0x19   : > { %s3606_s28 = smov [#allocation10]   ;;  %p2327_p6 = scmp.ge.s32.totalorder %s3604_s22, 2 }
  0x1a   : > { %p3715_p3 = pnand %p2322_p0, %p341_p2  ;;  %s354_s29 = sshll.u32 %s3606_s28, 4  ;;  %s355_s29 = int_to_ptr.vmem [resolvable:$true] %s354_s29 }
  0x1b   : > { %s4048_s5 = sld [smem:[#allocation36_spill]]  ;;  %s4023_s15 = smov 128  }
  0x1c   : > { %p3113_p4 = pneg %p3715_p3  ;;  %s4024_s16 = smov 8  }
  0x1d   : > { %s3609_s24 = smov [#allocation13]   ;;  %s3610_s28 = smov 256  }
  0x1e   : > { %s352_s26 = sshll.u32 %s4045_s3, 4  ;;  %p3723_p5 = pnand %p3113_p4, %p71_p1  ;;  %s353_s26 = int_to_ptr.hbm [resolvable:$true] %s352_s26 }
  0x1f   : > { %s380_s25 = sshll.u32 %s3609_s24, 4  ;;  %s3611_s12 = smov 16   ;;  %s381_s25 = int_to_ptr.vmem [resolvable:$true] %s380_s25 }
  0x20   : > { %3116 = dma.hbm_to_vmem [thread:$0]  (!%p3723_p5), %s353_s26, 4096, %s355_s29, [#allocation11], %s4023_s15, %s4023_s15, %s4024_s16  }
  0x21   : > { %s378_s14 = sshll.u32 %s4048_s5, 4  ;;  %s4025_s13 = sadd.s32 4294967294, %s3604_s22   ;;  %s379_s14 = int_to_ptr.hbm [resolvable:$true] %s378_s14 }
  0x22   : > { %3122 = dma.hbm_to_vmem [thread:$0]  (!%p3723_p5), %s379_s14, 8192, %s381_s25, [#allocation14], %s3610_s28, %s3610_s28, %s3611_s12  }
  0x23   : > { %s48_s3 = sadd.s32 1, %s3600_s21  ;;  %s57_s5 = sadd.s32 1, %s3592_s19 }
  0x24   : > { %p50_p7 = scmp.ge.s32.totalorder %s48_s3, 2  ;;  %p64_p8 = scmp.ne.s32.totalorder %s3592_s19, %s3588_s18 }
  0x25   : > { %p65_p9 = scmp.eq.s32.totalorder %s3604_s22, 0  ;;  %p70_p11 = scmp.ne.s32.totalorder %s3588_s18, %s3584_s17 }
  0x26   : > { %s4077_s3 = smov (%p50_p7, %s48_s3), 0  ;;  %p276_p12 = scmp.eq.s32.totalorder %s3707_s23, 1 }
  0x27   : > { %4049 = sst [smem:[#allocation29_spill]] %s4077_s3  ;;  %p3746_p10 = por %p65_p9, %p64_p8 }
  0x28   : > { %s52_s29 = ssub.s32 %s3600_s21, %s4077_s3  ;;  %p3757_p0 = por %p71_p1, %p70_p11 }
  0x29   : > { %p55_p13 = scmp.eq.s32.totalorder %s52_s29, 0  ;;  %p3761_p2 = por %p276_p12, %p64_p8 }
  0x2a   : > { %p282_p4 = scmp.eq.s32.totalorder %s4025_s13, 1  ;;  %p3150_p9 = scmp.lt.s32.totalorder %s3604_s22, 2 }
  0x2b   : > { %s3768_s25 = scalar_select %p55_p13, %s3592_s19, %s57_s5  }
  0x2c   : > { %p3770_p7 = por %p282_p4, %p70_p11  ;;  %s4030_s12 = sand.u32 1, %s3592_s19  }
  0x2d   : > { %4053 = sst [smem:[#allocation30_spill]] %s3768_s25  ;;  %s3777_s29 = sshll.u32 %s3600_s21, 3 }
  0x2e   : > { %s4054_s28 = scalar_select %p3770_p7, 1, 0 }
  0x2f   : > { %s3781_s15 = sshll.u32 %s4030_s12, 3  ;;  %p3785_p8 = pnand %p3150_p9, %p3746_p10 }
  0x30   : > { %4055 = sst [smem:[#allocation31_spill]] %s4054_s28  ;;  %s436_s5 = sand.u32 1, %s3604_s22  }
  0x31   : > { %s4057_s1 = sld [smem:[#allocation33_spill]]  ;;  %s440_s28 = scalar_lea.vmem [#allocation7], %s3781_s15 }
  0x32   : > { %s449_s21 = sshll.u32 %s440_s28, 4  ;;  %s4058_s4 = sld [smem:[#allocation35_spill]]  ;;  %s450_s21 = int_to_ptr.vmem [resolvable:$true] %s449_s21 }
  0x33   : > { %s437_s8 = scalar_lea.sflag [#allocation8], %s436_s5  ;;  %s3612_s22 = smov [#allocation12]  }
  0x34   : > { %s369_s3 = sshll.u32 %s3612_s22, 4  ;;  %s4059_s7 = sld [smem:[#allocation37_spill]]  ;;  %s370_s3 = int_to_ptr.vmem [resolvable:$true] %s369_s3 }
  0x35   : > { %s3613_s28 = smov [#allocation15]   ;;  %s4060_s0 = sld [smem:[#allocation32_spill]] }
  0x36   : > { %s397_s12 = sshll.u32 %s3613_s28, 4  ;;  %s4061_s22 = smov 8   ;;  %s398_s12 = int_to_ptr.vmem [resolvable:$true] %s397_s12 }
  0x37   : > { %s445_s25 = scalar_lea.hbm %s4057_s1, %s3777_s29  ;;  %s4062_s26 = smov 128  }
  0x38   : > { %s447_s17 = sshll.u32 %s445_s25, 4  ;;  %s367_s9 = sshll.u32 %s4058_s4, 4  ;;  %s448_s17 = int_to_ptr.hbm [resolvable:$true] %s447_s17  ;;  %s368_s9 = int_to_ptr.hbm [resolvable:$true] %s367_s9 }
  0x39   : > { %3132 = dma.hbm_to_vmem [thread:$0]  (!%p3785_p8), %s448_s17, 128, %s450_s21, %s437_s8  }
  0x3a   : > { %s395_s25 = sshll.u32 %s4059_s7, 4  ;;  %s418_s13 = scalar_lea.vmem [#allocation4], %s3781_s15  ;;  %s396_s25 = int_to_ptr.hbm [resolvable:$true] %s395_s25 }
  0x3b   : > { %3119 = dma.hbm_to_vmem [thread:$0]  (!%p3723_p5), %s368_s9, 32, %s370_s3, [#allocation11]  }
  0x3c   : > { %s425_s21 = scalar_lea.hbm %s4060_s0, %s3777_s29  ;;  %s429_s4 = sshll.u32 %s418_s13, 4  ;;  %s430_s4 = int_to_ptr.vmem [resolvable:$true] %s429_s4 }
  0x3d   : > { %3125 = dma.hbm_to_vmem [thread:$0]  (!%p3723_p5), %s396_s25, 4096, %s398_s12, [#allocation14], %s4062_s26, %s4062_s26, %s4061_s22  }
  0x3e   : > { %s427_s1 = sshll.u32 %s425_s21, 4  ;;  %s4063_s7 = sand.u32 1, %s3592_s19   ;;  %s428_s1 = int_to_ptr.hbm [resolvable:$true] %s427_s1 }
  0x3f   : > { %s415_s9 = scalar_lea.sflag [#allocation5], %s4063_s7  ;;  %s465_s5 = scalar_lea.hbm %s4013_s2, %s3777_s29 }
  0x40   : > { %3129 = dma.hbm_to_vmem [thread:$0]  (!%p3785_p8), %s428_s1, 128, %s430_s4, %s415_s9  }
  0x41   : > { %s467_s17 = sshll.u32 %s465_s5, 4  ;;  %s460_s0 = scalar_lea.vmem [#allocation9], %s3781_s15  ;;  %s468_s17 = int_to_ptr.hbm [resolvable:$true] %s467_s17 }
  0x42   : > { %s469_s30 = sshll.u32 %s460_s0, 4  ;;  %478 = sbr.rel (%p3715_p3) target bundleno = 1125 (0x465), region = 56  ;;  %s470_s30 = int_to_ptr.vmem [resolvable:$true] %s469_s30 }
  0x43   : > { %3135 = dma.hbm_to_vmem [thread:$0]  (!%p3785_p8), %s468_s17, 128, %s470_s30, %s437_s8  }
  0x44   : > { %s3829_s25 = sand.u32 (!%p3715_p3), 1, %s3588_s18  }
  0x45   : > { %s3832_s4 = sshll.u32 (!%p3715_p3), %s3829_s25, 3  ;;  %s481_s7 = scalar_lea.sflag (!%p3715_p3), [#allocation5], %s3829_s25 }
  0x46   : > { %s484_s29 = scalar_lea.vmem (!%p3715_p3), [#allocation4], %s3832_s4 }
  0x47   : > { %3559 = dma.done.wait (%p3757_p0), %s481_s7, 128  }
  0x48   : > { %3561 = vsyncadd (%p3757_p0), %s481_s7, 4294967168  ;;  %s490_s0 = sand.u32 1, %s3707_s23   ;;  %s494_s27 = scalar_lea.vmem [#allocation7], %s3832_s4 }
  0x49   : > { %s491_s8 = scalar_lea.sflag [#allocation8], %s490_s0 }
  0x4a   : > { %3563 = dma.done.wait (%p3757_p0), %s491_s8, 256  }
  0x4b   : > { %3565 = vsyncadd (%p3757_p0), %s491_s8, 4294967040  ;;  %s504_s15 = scalar_lea.vmem [#allocation9], %s3832_s4 }
  0x4c   : > { %3567 = dma.done.wait (%p71_p1), [#allocation11], 4128  }
  0x4d   : > { %3569 = vsyncadd (%p71_p1), [#allocation11], 4294963168 }
  0x4e   : > { %3571 = dma.done.wait (%p71_p1), [#allocation14], 12288  }
  0x4f   : > { %3573 = vsyncadd (%p71_p1), [#allocation14], 4294955008  ;;  %v2461_v0 = vld [vmem:[#allocation13 + $0xe0] sm:$0xf]  ;;  %v2968_v1 = vld [vmem:[#allocation13 + $0xec] sm:$0xf0] }
  0x50   : > { %v2589_v2 = vld [vmem:[#allocation13 + $0x1e0] sm:$0xf]  ;;  %v2462_v3 = vor.u32 %v2968_v1, %v2461_v0  ;;  %v3000_v4 = vld [vmem:[#allocation13 + $0x1ec] sm:$0xf0]  ;;  %v2966_v5 = vld [vmem:[#allocation13 + $0xe4] sm:$0xf] }
  0x51   : > { %v2463_v6 = vld [vmem:[#allocation13 + $0xf0] sm:$0xf0]  ;;  %v2590_v7 = vor.u32 %v3000_v4, %v2589_v2  ;;  %v2998_v9 = vld [vmem:[#allocation13 + $0x1e4] sm:$0xf]  ;;  %v2445_v11 = vld [vmem:[#allocation13 + $0xc0] sm:$0xf] }
  0x52   : > { %v2466_v8 = vor.u32 %v2966_v5, %v2463_v6  ;;  %v2591_v10 = vld [vmem:[#allocation13 + $0x1f0] sm:$0xf0]  ;;  %991 = vmatpush.bf16.msra.mxu0 %v2462_v3  ;;  %v2964_v13 = vld [vmem:[#allocation13 + $0xcc] sm:$0xf0]  ;;  %v2573_v14 = vld [vmem:[#allocation13 + $0x1c0] sm:$0xf] }
  0x53   : > { %v2594_v12 = vor.u32 %v2998_v9, %v2591_v10  ;;  %v2996_v15 = vld [vmem:[#allocation13 + $0x1cc] sm:$0xf0]  ;;  %1004 = vmatpush.bf16.msra.mxu1 %v2590_v7  ;;  %v2446_v16 = vor.u32 %v2964_v13, %v2445_v11  ;;  %v2962_v18 = vld [vmem:[#allocation13 + $0xc4] sm:$0xf]  ;;  %v2447_v19 = vld [vmem:[#allocation13 + $0xd0] sm:$0xf0] }
  0x54   : > { %1017 = vmatpush.bf16.msra.mxu2 %v2466_v8  ;;  %v2574_v17 = vor.u32 %v2996_v15, %v2573_v14  ;;  %v2994_v20 = vld [vmem:[#allocation13 + $0x1c4] sm:$0xf]  ;;  %v2450_v21 = vor.u32 %v2962_v18, %v2447_v19  ;;  %v2575_v22 = vld [vmem:[#allocation13 + $0x1d0] sm:$0xf0]  ;;  %v2429_v23 = vld [vmem:[#allocation13 + $0xa0] sm:$0xf] }
  0x55   : > { %1030 = vmatpush.bf16.msra.mxu3 %v2594_v12  ;;  %v2960_v24 = vld [vmem:[#allocation13 + $0xac] sm:$0xf0]  ;;  %v2578_v25 = vor.u32 %v2994_v20, %v2575_v22  ;;  %v2557_v26 = vld [vmem:[#allocation13 + $0x1a0] sm:$0xf]  ;;  %v2958_v28 = vld [vmem:[#allocation13 + $0xa4] sm:$0xf] }
  0x56   : > { %v2992_v27 = vld [vmem:[#allocation13 + $0x1ac] sm:$0xf0]  ;;  %992 = vmatpush.bf16.msra.mxu0 %v2446_v16  ;;  %v2430_v29 = vor.u32 %v2960_v24, %v2429_v23  ;;  %v2431_v30 = vld [vmem:[#allocation13 + $0xb0] sm:$0xf0]  ;;  %v2990_v31 = vld [vmem:[#allocation13 + $0x1a4] sm:$0xf] }
  0x57   : > { %v2559_v32 = vld [vmem:[#allocation13 + $0x1b0] sm:$0xf0]  ;;  %1005 = vmatpush.bf16.msra.mxu1 %v2574_v17  ;;  %v2558_v33 = vor.u32 %v2992_v27, %v2557_v26  ;;  %v2434_v34 = vor.u32 %v2958_v28, %v2431_v30  ;;  %v2413_v35 = vld [vmem:[#allocation13 + $0x80] sm:$0xf]  ;;  %v2956_v36 = vld [vmem:[#allocation13 + $0x8c] sm:$0xf0] }
  0x58   : > { %1018 = vmatpush.bf16.msra.mxu2 %v2450_v21  ;;  %v2541_v37 = vld [vmem:[#allocation13 + $0x180] sm:$0xf]  ;;  %v2562_v38 = vor.u32 %v2990_v31, %v2559_v32  ;;  %v2988_v39 = vld [vmem:[#allocation13 + $0x18c] sm:$0xf0]  ;;  %v2954_v40 = vld [vmem:[#allocation13 + $0x84] sm:$0xf]  ;;  %v2414_v44 = vor.u32 %v2956_v36, %v2413_v35 }
  0x59   : > { %1031 = vmatpush.bf16.msra.mxu3 %v2578_v25  ;;  %v2415_v41 = vld [vmem:[#allocation13 + $0x90] sm:$0xf0]  ;;  %v2986_v42 = vld [vmem:[#allocation13 + $0x184] sm:$0xf]  ;;  %v2542_v45 = vor.u32 %v2988_v39, %v2541_v37  ;;  %v2397_v47 = vld [vmem:[#allocation13 + $0x60] sm:$0xf] }
  0x5a   : > { %v2543_v43 = vld [vmem:[#allocation13 + $0x190] sm:$0xf0]  ;;  %993 = vmatpush.bf16.msra.mxu0 %v2430_v29  ;;  %v2418_v46 = vor.u32 %v2954_v40, %v2415_v41  ;;  %v2952_v48 = vld [vmem:[#allocation13 + $0x6c] sm:$0xf0]  ;;  %v2525_v49 = vld [vmem:[#allocation13 + $0x160] sm:$0xf] }
  0x5b   : > { %1006 = vmatpush.bf16.msra.mxu1 %v2558_v33  ;;  %v2546_v50 = vor.u32 %v2986_v42, %v2543_v43  ;;  %v2984_v51 = vld [vmem:[#allocation13 + $0x16c] sm:$0xf0]  ;;  %v2950_v52 = vld [vmem:[#allocation13 + $0x64] sm:$0xf]  ;;  %v2399_v53 = vld [vmem:[#allocation13 + $0x70] sm:$0xf0]  ;;  %v2398_v56 = vor.u32 %v2952_v48, %v2397_v47 }
  0x5c   : > { %1019 = vmatpush.bf16.msra.mxu2 %v2434_v34  ;;  %v2982_v54 = vld [vmem:[#allocation13 + $0x164] sm:$0xf]  ;;  %v2527_v55 = vld [vmem:[#allocation13 + $0x170] sm:$0xf0]  ;;  %v2526_v57 = vor.u32 %v2984_v51, %v2525_v49  ;;  %v2402_v58 = vor.u32 %v2950_v52, %v2399_v53  ;;  %v2381_v59 = vld [vmem:[#allocation13 + $0x40] sm:$0xf] }
  0x5d   : > { %1032 = vmatpush.bf16.msra.mxu3 %v2562_v38  ;;  %v2948_v60 = vld [vmem:[#allocation13 + $0x4c] sm:$0xf0]  ;;  %v2509_v61 = vld [vmem:[#allocation13 + $0x140] sm:$0xf]  ;;  %v2530_v62 = vor.u32 %v2982_v54, %v2527_v55  ;;  %v2946_v0 = vld [vmem:[#allocation13 + $0x44] sm:$0xf] }
  0x5e   : > { %994 = vmatpush.bf16.msra.mxu0 %v2414_v44  ;;  %v2980_v63 = vld [vmem:[#allocation13 + $0x14c] sm:$0xf0]  ;;  %v2383_v1 = vld [vmem:[#allocation13 + $0x50] sm:$0xf0]  ;;  %v2978_v2 = vld [vmem:[#allocation13 + $0x144] sm:$0xf]  ;;  %v2382_v4 = vor.u32 %v2948_v60, %v2381_v59 }
  0x5f   : > { %1007 = vmatpush.bf16.msra.mxu1 %v2542_v45  ;;  %v2511_v3 = vld [vmem:[#allocation13 + $0x150] sm:$0xf0]  ;;  %v2510_v5 = vor.u32 %v2980_v63, %v2509_v61  ;;  %v2386_v6 = vor.u32 %v2946_v0, %v2383_v1  ;;  %v2365_v7 = vld [vmem:[#allocation13 + $0x20] sm:$0xf]  ;;  %v2944_v8 = vld [vmem:[#allocation13 + $0x2c] sm:$0xf0] }
  0x60   : > { %1020 = vmatpush.bf16.msra.mxu2 %v2418_v46  ;;  %v2493_v9 = vld [vmem:[#allocation13 + $0x120] sm:$0xf]  ;;  %v2514_v10 = vor.u32 %v2978_v2, %v2511_v3  ;;  %v2976_v11 = vld [vmem:[#allocation13 + $0x12c] sm:$0xf0]  ;;  %v2942_v12 = vld [vmem:[#allocation13 + $0x24] sm:$0xf]  ;;  %v2366_v16 = vor.u32 %v2944_v8, %v2365_v7 }
  0x61   : > { %1033 = vmatpush.bf16.msra.mxu3 %v2546_v50  ;;  %v2367_v13 = vld [vmem:[#allocation13 + $0x30] sm:$0xf0]  ;;  %v2974_v14 = vld [vmem:[#allocation13 + $0x124] sm:$0xf]  ;;  %v2494_v18 = vor.u32 %v2976_v11, %v2493_v9  ;;  %v2349_v20 = vld [vmem:[#allocation13] sm:$0xf] }
  0x62   : > { %995 = vmatpush.bf16.msra.mxu0 %v2398_v56  ;;  %v2495_v15 = vld [vmem:[#allocation13 + $0x130] sm:$0xf0]  ;;  %v589_v17 = vld [vmem:[%s494_s27] sm:$0xff]  ;;  %v2370_v19 = vor.u32 %v2942_v12, %v2367_v13  ;;  %v2940_v21 = vld [vmem:[#allocation13 + $0xc] sm:$0xf0]  ;;  %s3875_s12 = scalar_lea.vmem [#allocation17], %s3832_s4 }
  0x63   : > { %1008 = vmatpush.bf16.msra.mxu1 %v2526_v57  ;;  %v2477_v22 = vld [vmem:[#allocation13 + $0x100] sm:$0xf]  ;;  %v2498_v23 = vor.u32 %v2974_v14, %v2495_v15  ;;  %v2972_v24 = vld [vmem:[#allocation13 + $0x10c] sm:$0xf0]  ;;  %v2938_v25 = vld [vmem:[#allocation13 + $0x4] sm:$0xf]  ;;  %v665_v29 = vunpack.c.l.b16 %v589_v17  ;;  %v2350_v30 = vor.u32 %v2940_v21, %v2349_v20  ;;  %v666_v31 = vunpack.c.h.b16 %v589_v17 }
  0x64   : > { %1021 = vmatpush.bf16.msra.mxu2 %v2402_v58  ;;  %v2351_v26 = vld [vmem:[#allocation13 + $0x10] sm:$0xf0]  ;;  %v2970_v27 = vld [vmem:[#allocation13 + $0x104] sm:$0xf]  ;;  %v2478_v32 = vor.u32 %v2972_v24, %v2477_v22  ;;  %v2967_v37 = vld [vmem:[#allocation13 + $0xec] sm:$0xf] }
  0x65   : > { %1034 = vmatpush.bf16.msra.mxu3 %v2530_v62  ;;  %v2479_v28 = vld [vmem:[#allocation13 + $0x110] sm:$0xf0]  ;;  %v2354_v33 = vor.u32 %v2938_v25, %v2351_v26  ;;  %v3859_v35 = vpack.c.b16 %v665_v29, %v665_v29  ;;  %v3861_v36 = vpack.c.b16 %v666_v31, %v666_v31  ;;  %v2471_v38 = vld [vmem:[#allocation13 + $0xf8] sm:$0xf0]  ;;  %v2999_v39 = vld [vmem:[#allocation13 + $0x1ec] sm:$0xf] }
  0x66   : > { %996 = vmatpush.bf16.msra.mxu0 %v2382_v4  ;;  %v2482_v34 = vor.u32 %v2970_v27, %v2479_v28  ;;  %v2474_v40 = vor.u32 %v2967_v37, %v2471_v38  ;;  %v2599_v41 = vld [vmem:[#allocation13 + $0x1f8] sm:$0xf0]  ;;  %v2963_v42 = vld [vmem:[#allocation13 + $0xcc] sm:$0xf]  ;;  %v2469_v45 = vld [vmem:[#allocation13 + $0xe8] sm:$0xf] }
  0x67   : > { %1009 = vmatpush.bf16.msra.mxu1 %v2510_v5  ;;  %v2455_v43 = vld [vmem:[#allocation13 + $0xd8] sm:$0xf0]  ;;  %v2602_v44 = vor.u32 %v2999_v39, %v2599_v41  ;;  %v2969_v46 = vld [vmem:[#allocation13 + $0xf4] sm:$0xf0]  ;;  %v2995_v47 = vld [vmem:[#allocation13 + $0x1cc] sm:$0xf] }
  0x68   : > { %1022 = vmatpush.bf16.msra.mxu2 %v2386_v6  ;;  %v2458_v48 = vor.u32 %v2963_v42, %v2455_v43  ;;  %v2470_v49 = vor.u32 %v2969_v46, %v2469_v45  ;;  %v2583_v50 = vld [vmem:[#allocation13 + $0x1d8] sm:$0xf0]  ;;  %v2597_v51 = vld [vmem:[#allocation13 + $0x1e8] sm:$0xf]  ;;  %v3001_v52 = vld [vmem:[#allocation13 + $0x1f4] sm:$0xf0] }
  0x69   : > { %1035 = vmatpush.bf16.msra.mxu3 %v2514_v10  ;;  %v2586_v53 = vor.u32 %v2995_v47, %v2583_v50  ;;  %v2598_v54 = vor.u32 %v3001_v52, %v2597_v51  ;;  %v2959_v55 = vld [vmem:[#allocation13 + $0xac] sm:$0xf]  ;;  %v2439_v56 = vld [vmem:[#allocation13 + $0xb8] sm:$0xf0]  ;;  %v2453_v57 = vld [vmem:[#allocation13 + $0xc8] sm:$0xf] }
  0x6a   : > { %997 = vmatpush.bf16.msra.mxu0 %v2366_v16  ;;  %v2965_v58 = vld [vmem:[#allocation13 + $0xd4] sm:$0xf0]  ;;  %v2991_v59 = vld [vmem:[#allocation13 + $0x1ac] sm:$0xf]  ;;  %v2567_v60 = vld [vmem:[#allocation13 + $0x1b8] sm:$0xf0]  ;;  %v2442_v0 = vor.u32 %v2959_v55, %v2439_v56 }
  0x6b   : > { %1010 = vmatpush.bf16.msra.mxu1 %v2494_v18  ;;  %v2454_v61 = vor.u32 %v2965_v58, %v2453_v57  ;;  %v2581_v62 = vld [vmem:[#allocation13 + $0x1c8] sm:$0xf]  ;;  %v2997_v63 = vld [vmem:[#allocation13 + $0x1d4] sm:$0xf0]  ;;  %v2570_v4 = vor.u32 %v2991_v59, %v2567_v60  ;;  %v2955_v5 = vld [vmem:[#allocation13 + $0x8c] sm:$0xf] }
  0x6c   : > { %1023 = vmatpush.bf16.msra.mxu2 %v2370_v19  ;;  %v2582_v1 = vor.u32 %v2997_v63, %v2581_v62  ;;  %v2437_v2 = vld [vmem:[#allocation13 + $0xa8] sm:$0xf]  ;;  %v2961_v3 = vld [vmem:[#allocation13 + $0xb4] sm:$0xf0]  ;;  %v2423_v6 = vld [vmem:[#allocation13 + $0x98] sm:$0xf0] }
  0x6d   : > { %1036 = vmatpush.bf16.msra.mxu3 %v2498_v23  ;;  %v2565_v7 = vld [vmem:[#allocation13 + $0x1a8] sm:$0xf]  ;;  %v2438_v8 = vor.u32 %v2961_v3, %v2437_v2  ;;  %v2987_v9 = vld [vmem:[#allocation13 + $0x18c] sm:$0xf]  ;;  %v2551_v10 = vld [vmem:[#allocation13 + $0x198] sm:$0xf0]  ;;  %v2426_v15 = vor.u32 %v2955_v5, %v2423_v6 }
  0x6e   : > { %998 = vmatpush.bf16.msra.mxu0 %v2350_v30  ;;  %v2993_v11 = vld [vmem:[#allocation13 + $0x1b4] sm:$0xf0]  ;;  %v2421_v13 = vld [vmem:[#allocation13 + $0x88] sm:$0xf]  ;;  %v2554_v18 = vor.u32 %v2987_v9, %v2551_v10  ;;  %v2951_v19 = vld [vmem:[#allocation13 + $0x6c] sm:$0xf] }
  0x6f   : > { %1011 = vmatpush.bf16.msra.mxu1 %v2478_v32  ;;  %v2566_v12 = vor.u32 %v2993_v11, %v2565_v7  ;;  %v2957_v14 = vld [vmem:[#allocation13 + $0x94] sm:$0xf0]  ;;  %v2549_v16 = vld [vmem:[#allocation13 + $0x188] sm:$0xf]  ;;  %v2407_v20 = vld [vmem:[#allocation13 + $0x78] sm:$0xf0] }
  0x70   : > { %1024 = vmatpush.bf16.msra.mxu2 %v2354_v33  ;;  %v2989_v17 = vld [vmem:[#allocation13 + $0x194] sm:$0xf0]  ;;  %v3870_v21 = vld [vmem:[%s4017_s6] sm:$0xf]  ;;  %v2422_v22 = vor.u32 %v2957_v14, %v2421_v13  ;;  %v2983_v23 = vld [vmem:[#allocation13 + $0x16c] sm:$0xf]  ;;  %v2410_v28 = vor.u32 %v2951_v19, %v2407_v20 }
  0x71   : > { %1037 = vmatpush.bf16.msra.mxu3 %v2482_v34  ;;  %999 = vmatmul.bf16.vlgmr.msra.gmra.mxu0 %v3859_v35  ;;  %v2535_v24 = vld [vmem:[#allocation13 + $0x178] sm:$0xf0]  ;;  %v2550_v25 = vor.u32 %v2989_v17, %v2549_v16  ;;  %v2405_v26 = vld [vmem:[#allocation13 + $0x68] sm:$0xf]  ;;  %v2953_v27 = vld [vmem:[#allocation13 + $0x74] sm:$0xf0] }
  0x72   : > { %1012 = vmatmul.bf16.vlgmr.msra.gmra.mxu1 %v3861_v36  ;;  %1043 = vmatpush.bf16.msrb.mxu0 %v2470_v49  ;;  %v2533_v29 = vld [vmem:[#allocation13 + $0x168] sm:$0xf]  ;;  %v2985_v30 = vld [vmem:[#allocation13 + $0x174] sm:$0xf0]  ;;  %v656_v31 = vperm.slane %v3870_v21, 0  ;;  %v2538_v33 = vor.u32 %v2983_v23, %v2535_v24  ;;  %v2406_v39 = vor.u32 %v2953_v27, %v2405_v26  ;;  %v657_v49 = vperm.slane %v3870_v21, 1 }
  0x73   : > { %1025 = vmatmul.bf16.vlgmr.msra.gmra.mxu2 %v3859_v35  ;;  %1056 = vmatpush.bf16.msrb.mxu1 %v2598_v54  ;;  %v2947_v34 = vld [vmem:[#allocation13 + $0x4c] sm:$0xf]  ;;  %v2391_v37 = vld [vmem:[#allocation13 + $0x58] sm:$0xf0]  ;;  %v2534_v42 = vor.u32 %v2985_v30, %v2533_v29  ;;  %v2389_v43 = vld [vmem:[#allocation13 + $0x48] sm:$0xf] }
  0x74   : > { %1038 = vmatmul.bf16.vlgmr.msra.gmra.mxu3 %v3861_v36  ;;  %1069 = vmatpush.bf16.msrb.mxu2 %v2474_v40  ;;  %v2979_v40 = vld [vmem:[#allocation13 + $0x14c] sm:$0xf]  ;;  %v2519_v41 = vld [vmem:[#allocation13 + $0x158] sm:$0xf0]  ;;  %v2394_v45 = vor.u32 %v2947_v34, %v2391_v37  ;;  %v2517_v46 = vld [vmem:[#allocation13 + $0x148] sm:$0xf] }
  0x75   : > { %1082 = vmatpush.bf16.msrb.mxu3 %v2602_v44  ;;  %v2949_v44 = vld [vmem:[#allocation13 + $0x54] sm:$0xf0]  ;;  %v2522_v50 = vor.u32 %v2979_v40, %v2519_v41  ;;  %v2943_v51 = vld [vmem:[#allocation13 + $0x2c] sm:$0xf]  ;;  %v2375_v52 = vld [vmem:[#allocation13 + $0x38] sm:$0xf0] }
  0x76   : > { %1044 = vmatpush.bf16.msrb.mxu0 %v2454_v61  ;;  %v2981_v47 = vld [vmem:[#allocation13 + $0x154] sm:$0xf0]  ;;  %v2975_v54 = vld [vmem:[#allocation13 + $0x12c] sm:$0xf]  ;;  %v2503_v55 = vld [vmem:[#allocation13 + $0x138] sm:$0xf0]  ;;  %v2378_v60 = vor.u32 %v2943_v51, %v2375_v52 }
  0x77   : > { %1057 = vmatpush.bf16.msrb.mxu1 %v2582_v1  ;;  %v2518_v56 = vor.u32 %v2981_v47, %v2517_v46  ;;  %v2373_v57 = vld [vmem:[#allocation13 + $0x28] sm:$0xf]  ;;  %v2945_v58 = vld [vmem:[#allocation13 + $0x34] sm:$0xf0]  ;;  %v2506_v3 = vor.u32 %v2975_v54, %v2503_v55  ;;  %v2359_v5 = vld [vmem:[#allocation13 + $0x18] sm:$0xf0] }
  0x78   : > { %1070 = vmatpush.bf16.msrb.mxu2 %v2458_v48  ;;  %v2501_v61 = vld [vmem:[#allocation13 + $0x128] sm:$0xf]  ;;  %v2977_v62 = vld [vmem:[#allocation13 + $0x134] sm:$0xf0]  ;;  %v3016_v7 = vld [vmem:[#allocation10 + $0x74] sm:$0xf]  ;;  %v2374_v9 = vor.u32 %v2945_v58, %v2373_v57 }
  0x79   : > { %1083 = vmatpush.bf16.msrb.mxu3 %v2586_v53  ;;  %v2390_v53 = vor.u32 %v2949_v44, %v2389_v43  ;;  %v2971_v10 = vld [vmem:[#allocation13 + $0x10c] sm:$0xf]  ;;  %v3032_v13 = vld [vmem:[#allocation10 + $0xf4] sm:$0xf]  ;;  %v2727_v14 = vld [vmem:[#allocation10 + $0xf8] sm:$0xf0] }
  0x7a   : > { %1045 = vmatpush.bf16.msrb.mxu0 %v2438_v8  ;;  %v2663_v8 = vld [vmem:[#allocation10 + $0x78] sm:$0xf0]  ;;  %v2357_v17 = vld [vmem:[#allocation13 + $0x8] sm:$0xf]  ;;  %v2661_v19 = vld [vmem:[#allocation10 + $0x70] sm:$0xf]  ;;  %v2730_v30 = vor.u32 %v3032_v13, %v2727_v14 }
  0x7b   : > { %1058 = vmatpush.bf16.msrb.mxu1 %v2566_v12  ;;  %v2487_v12 = vld [vmem:[#allocation13 + $0x118] sm:$0xf0]  ;;  %v2485_v23 = vld [vmem:[#allocation13 + $0x108] sm:$0xf]  ;;  %v2973_v24 = vld [vmem:[#allocation13 + $0x114] sm:$0xf0] }
  0x7c   : > { %1071 = vmatpush.bf16.msrb.mxu2 %v2442_v0  ;;  %v2490_v26 = vor.u32 %v2971_v10, %v2487_v12  ;;  %v2725_v27 = vld [vmem:[#allocation10 + $0xf0] sm:$0xf]  ;;  %v2486_v40 = vor.u32 %v2973_v24, %v2485_v23  ;;  %v2653_v43 = vld [vmem:[#allocation10 + $0x60] sm:$0xf]  ;;  %v3015_v44 = vld [vmem:[#allocation10 + $0x64] sm:$0xf0] }
  0x7d   : > { %1084 = vmatpush.bf16.msrb.mxu3 %v2570_v4  ;;  %v2939_v4 = vld [vmem:[#allocation13 + $0xc] sm:$0xf]  ;;  %v2717_v46 = vld [vmem:[#allocation10 + $0xe0] sm:$0xf]  ;;  %v3031_v47 = vld [vmem:[#allocation10 + $0xe4] sm:$0xf0]  ;;  %v2654_v51 = vor.u32 %v3015_v44, %v2653_v43 }
  0x7e   : > { %1046 = vmatpush.bf16.msrb.mxu0 %v2422_v22  ;;  %v2362_v16 = vor.u32 %v2939_v4, %v2359_v5  ;;  %v3017_v22 = vld [vmem:[#allocation10 + $0x74] sm:$0xf0]  ;;  %v3028_v52 = vld [vmem:[#allocation10 + $0xd4] sm:$0xf]  ;;  %v2718_v54 = vor.u32 %v3031_v47, %v2717_v46  ;;  %v3010_v57 = vld [vmem:[#allocation10 + $0x44] sm:$0xf] }
  0x7f   : > { %1059 = vmatpush.bf16.msrb.mxu1 %v2550_v25  ;;  %v2666_v25 = vor.u32 %v3016_v7, %v2663_v8  ;;  %v2662_v37 = vor.u32 %v3017_v22, %v2661_v19  ;;  %v2639_v58 = vld [vmem:[#allocation10 + $0x48] sm:$0xf0]  ;;  %v3008_v4 = vld [vmem:[#allocation10 + $0x34] sm:$0xf]  ;;  %v3011_v7 = vld [vmem:[#allocation10 + $0x44] sm:$0xf0] }
  0x80   : > { %1072 = vmatpush.bf16.msrb.mxu2 %v2426_v15  ;;  %v2502_v15 = vor.u32 %v2977_v62, %v2501_v61  ;;  %v3013_v61 = vld [vmem:[#allocation10 + $0x54] sm:$0xf0]  ;;  %v3026_v62 = vld [vmem:[#allocation10 + $0xc4] sm:$0xf]  ;;  %v3024_v8 = vld [vmem:[#allocation10 + $0xb4] sm:$0xf] }
  0x81   : > { %1085 = vmatpush.bf16.msrb.mxu3 %v2554_v18  ;;  %v2941_v18 = vld [vmem:[#allocation13 + $0x14] sm:$0xf0]  ;;  %v2701_v12 = vld [vmem:[#allocation10 + $0xc0] sm:$0xf]  ;;  %v3027_v13 = vld [vmem:[#allocation10 + $0xc4] sm:$0xf0] }
  0x82   : > { %1047 = vmatpush.bf16.msrb.mxu0 %v2406_v39  ;;  %v2719_v39 = vld [vmem:[#allocation10 + $0xe8] sm:$0xf0]  ;;  %v2695_v10 = vld [vmem:[#allocation10 + $0xb8] sm:$0xf0]  ;;  %v3006_v14 = vld [vmem:[#allocation10 + $0x24] sm:$0xf] }
  0x83   : > { %1060 = vmatpush.bf16.msrb.mxu1 %v2534_v42  ;;  %v3009_v19 = vld [vmem:[#allocation10 + $0x34] sm:$0xf0]  ;;  %v2687_v23 = vld [vmem:[#allocation10 + $0xa8] sm:$0xf0]  ;;  %v2613_v46 = vld [vmem:[#allocation10 + $0x10] sm:$0xf] }
  0x84   : > { %1073 = vmatpush.bf16.msrb.mxu2 %v2410_v28  ;;  %v3033_v28 = vld [vmem:[#allocation10 + $0xf4] sm:$0xf0]  ;;  %v2607_v43 = vld [vmem:[#allocation10 + $0x8] sm:$0xf0]  ;;  %vm1253_vm0 = vcmask 60416   ;;  %s3914_s21 = scalar_lea.vmem [#allocation19], %s3832_s4 }
  0x85   : > { %1086 = vmatpush.bf16.msrb.mxu3 %v2538_v33  ;;  %v2358_v33 = vor.u32 %v2941_v18, %v2357_v17  ;;  %v2726_v42 = vor.u32 %v3033_v28, %v2725_v27  ;;  %v2629_v18 = vld [vmem:[#allocation10 + $0x30] sm:$0xf]  ;;  %v3004_v27 = vld [vmem:[#allocation10 + $0x14] sm:$0xf]  ;;  %v3005_v47 = vld [vmem:[#allocation10 + $0x14] sm:$0xf0] }
  0x86   : > { %1048 = vmatpush.bf16.msrb.mxu0 %v2390_v53  ;;  %v2711_v53 = vld [vmem:[#allocation10 + $0xd8] sm:$0xf0]  ;;  %v2630_v22 = vor.u32 %v3009_v19, %v2629_v18  ;;  %vm1734_vm1 = vcmask 1043456   ;;  %vm1708_vm3 = vcmask 64512   ;;  %s2068_s22 = sshll.u32 %s3875_s12, 4  ;;  %s2085_s26 = sshll.u32 %s3914_s21, 4  ;;  %s2069_s22 = int_to_ptr.vmem [resolvable:$true] %s2068_s22  ;;  %s2086_s26 = int_to_ptr.vmem [resolvable:$true] %s2085_s26 }
  0x87   : > { %1061 = vmatpush.bf16.msrb.mxu1 %v2518_v56  ;;  %v2714_v56 = vor.u32 %v3028_v52, %v2711_v53  ;;  %v1286_v44 = vld [vmem:[%s484_s29] sm:$0xff]  ;;  %s3083_s1 = sshll.u32 %s3596_s20, 3  ;;  %s3943_s4 = scalar_lea.sflag [#allocation18], %s490_s0 }
  0x88   : > { %1074 = vmatpush.bf16.msrb.mxu2 %v2394_v45  ;;  %s2067_s3 = scalar_lea.hbm %s4021_s10, %s3083_s1  ;;  %s2084_s30 = scalar_lea.hbm %s4022_s11, %s3083_s1 }
  0x89   : > { %1087 = vmatpush.bf16.msrb.mxu3 %v2522_v50  ;;  %v2647_v50 = vld [vmem:[#allocation10 + $0x58] sm:$0xf0]  ;;  %s2070_s28 = sshll.u32 %s2067_s3, 4  ;;  %s2071_s28 = int_to_ptr.hbm [resolvable:$true] %s2070_s28 }
  0x8a   : > { %1049 = vmatpush.bf16.msrb.mxu0 %v2374_v9  ;;  %s3464_s7 = sshra.s32 %s2071_s28, 4  ;;  %s3465_s7 = int_to_ptr.hbm [resolvable:$true] %s3464_s7 }
  0x8b   : > { %1062 = vmatpush.bf16.msrb.mxu1 %v2502_v15  ;;  %v2702_v15 = vor.u32 %v3027_v13, %v2701_v12  ;;  %s3466_s29 = scalar_lea.hbm %s3465_s7, 8  ;;  %p3471_p10 = scmp.lt.s32.totalorder %s3465_s7, %s4021_s10 }
  0x8c   : > { %1075 = vmatpush.bf16.msrb.mxu2 %v2378_v60  ;;  %v2645_v60 = vld [vmem:[#allocation10 + $0x50] sm:$0xf]  ;;  %p3467_p1 = scmp.ne.s32.totalorder %s3465_s7, %s3466_s29 }
  0x8d   : > { %1088 = vmatpush.bf16.msrb.mxu3 %v2506_v3  ;;  %v3029_v3 = vld [vmem:[#allocation10 + $0xd4] sm:$0xf0] }
  0x8e   : > { %1050 = vmatpush.bf16.msrb.mxu0 %v2358_v33  ;;  %v3020_v33 = vld [vmem:[#allocation10 + $0x94] sm:$0xf]  ;;  %p3468_p3 = pnand %p3467_p1, %p3761_p2 }
  0x8f   : > { %1063 = vmatpush.bf16.msrb.mxu1 %v2486_v40  ;;  %v3023_v40 = vld [vmem:[#allocation10 + $0xa4] sm:$0xf0] }
  0x90   : > { %1076 = vmatpush.bf16.msrb.mxu2 %v2362_v16  ;;  %v2623_v16 = vld [vmem:[#allocation10 + $0x28] sm:$0xf0]  ;;  %p3469_p5 = pneg %p3468_p3 }
  0x91   : > { %1089 = vmatpush.bf16.msrb.mxu3 %v2490_v26  ;;  %1051 = vmatmul.bf16.vlgmr.msrb.gmra.mxu0 %v3859_v35  ;;  %v2626_v17 = vor.u32 %v3006_v14, %v2623_v16  ;;  %v3025_v26 = vld [vmem:[#allocation10 + $0xb4] sm:$0xf0] }
  0x92   : > { %1492 = vmatpush.bf16.msra.mxu0 %v2662_v37  ;;  %1064 = vmatmul.bf16.vlgmr.msrb.gmra.mxu1 %v3861_v36  ;;  %v2679_v37 = vld [vmem:[#allocation10 + $0x98] sm:$0xf0] }
  0x93   : > { %1505 = vmatpush.bf16.msra.mxu1 %v2726_v42  ;;  %1077 = vmatmul.bf16.vlgmr.msrb.gmra.mxu2 %v3859_v35  ;;  %v2631_v35 = vld [vmem:[#allocation10 + $0x38] sm:$0xf0] }
  0x94   : > { %1518 = vmatpush.bf16.msra.mxu2 %v2666_v25  ;;  %1090 = vmatmul.bf16.vlgmr.msrb.gmra.mxu3 %v3861_v36  ;;  %v2637_v36 = vld [vmem:[#allocation10 + $0x40] sm:$0xf]  ;;  %v2693_v25 = vld [vmem:[#allocation10 + $0xb0] sm:$0xf] }
  0x95   : > { %1531 = vmatpush.bf16.msra.mxu3 %v2730_v30  ;;  %v2638_v9 = vor.u32 %v3011_v7, %v2637_v36  ;;  %v2694_v28 = vor.u32 %v3025_v26, %v2693_v25 }
  0x96   : > { %1493 = vmatpush.bf16.msra.mxu0 %v2654_v51  ;;  %v2671_v51 = vld [vmem:[#allocation10 + $0x88] sm:$0xf0] }
  0x97   : > { %1506 = vmatpush.bf16.msra.mxu1 %v2718_v54  ;;  %v2677_v54 = vld [vmem:[#allocation10 + $0x90] sm:$0xf] }
  0xee   : > { %v1000_v32 = vpop.f32.mrf.mxu0 }
  0xef   : > { %v1013_v38 = vpop.f32.mrf.mxu1  ;;  %v1001_v48 = vadd.f32 %v1000_v32, %v656_v31  ;;  %v3014_v31 = vld [vmem:[#allocation10 + $0x64] sm:$0xf]  ;;  %v2655_v32 = vld [vmem:[#allocation10 + $0x68] sm:$0xf0] }
  0xf0   : > { %v2658_v45 = vor.u32 %v3014_v31, %v2655_v32  ;;  %v2621_v31 = vld [vmem:[#allocation10 + $0x20] sm:$0xf]  ;;  %v3007_v32 = vld [vmem:[#allocation10 + $0x24] sm:$0xf0] }
  0xf1   : > { %v1014_v63 = vadd.f32 %v1013_v38, %v1001_v48  ;;  %v3030_v38 = vld [vmem:[#allocation10 + $0xe4] sm:$0xf] }
  0xf2   : > { %v2722_v48 = vor.u32 %v3030_v38, %v2719_v39  ;;  %1519 = vmatpush.bf16.msra.mxu2 %v2658_v45  ;;  %v2682_v38 = vor.u32 %v3020_v33, %v2679_v37  ;;  %v2685_v39 = vld [vmem:[#allocation10 + $0xa0] sm:$0xf] }
  0xf3   : > { %v2686_v42 = vor.u32 %v3023_v40, %v2685_v39 }
  0xf4   : > { %1532 = vmatpush.bf16.msra.mxu3 %v2722_v48  ;;  %v3018_v48 = vld [vmem:[#allocation10 + $0x84] sm:$0xf] }
  0xf5   : > { %v2674_v52 = vor.u32 %v3018_v48, %v2671_v51 }
  0xf6   : > { %v1026_v59 = vpop.f32.mrf.mxu2  ;;  %v1002_v2 = vpop.f32.mrf.mxu0 }
  0xf7   : > { %v1027_v0 = vadd.f32 %v1026_v59, %v657_v49  ;;  %v1039_v1 = vpop.f32.mrf.mxu3  ;;  %v1015_v6 = vpop.f32.mrf.mxu1  ;;  %v3012_v49 = vld [vmem:[#allocation10 + $0x54] sm:$0xf]  ;;  %v2642_v59 = vor.u32 %v3010_v57, %v2639_v58  ;;  %v2709_v2 = vld [vmem:[#allocation10 + $0xd0] sm:$0xf] }
  0xf8   : > { %v2650_v55 = vor.u32 %v3012_v49, %v2647_v50  ;;  %1533 = vmatpush.bf16.msra.mxu3 %v2714_v56  ;;  %v2710_v5 = vor.u32 %v3029_v3, %v2709_v2  ;;  %v2634_v6 = vor.u32 %v3008_v4, %v2631_v35  ;;  %v1326_v49 = vunpack.c.l.b16 %v1286_v44 }
  0xf9   : > { %v1040_v11 = vadd.f32 %v1039_v1, %v1027_v0  ;;  %v2703_v0 = vld [vmem:[#allocation10 + $0xc8] sm:$0xf0]  ;;  %v2614_v50 = vor.u32 %v3005_v47, %v2613_v46  ;;  %v1327_v56 = vunpack.c.h.b16 %v1286_v44 }
  0xfa   : > { %1520 = vmatpush.bf16.msra.mxu2 %v2650_v55  ;;  %v2706_v1 = vor.u32 %v3026_v62, %v2703_v0  ;;  %1507 = vmatpush.bf16.msra.mxu1 %v2710_v5  ;;  %v1328_v53 = vpack.c.b16 %v1326_v49, %v1326_v49  ;;  %v3021_v55 = vld [vmem:[#allocation10 + $0x94] sm:$0xf0]  ;;  %v2669_v62 = vld [vmem:[#allocation10 + $0x80] sm:$0xf] }
  0xfb   : > { %v1095_v20 = vpack.c.bf16 %v1040_v11, %v1014_v63  ;;  %v2646_v63 = vor.u32 %v3013_v61, %v2645_v60  ;;  %v2698_v11 = vor.u32 %v3024_v8, %v2695_v10  ;;  %v2678_v57 = vor.u32 %v3021_v55, %v2677_v54  ;;  %v3003_v60 = vld [vmem:[#allocation10 + $0x4] sm:$0xf0] }
  0xfc   : > { %1534 = vmatpush.bf16.msra.mxu3 %v2706_v1  ;;  %v1329_v58 = vpack.c.b16 %v1327_v56, %v1327_v56 }
  0xfd   : > { %1103 = vst [vmem:[%s3875_s12] sm:$0xf] %v1095_v20  ;;  %v1098_v29 = vrot.slane %v1095_v20, 4  ;;  %1494 = vmatpush.bf16.msra.mxu0 %v2646_v63  ;;  %v3019_v63 = vld [vmem:[#allocation10 + $0x84] sm:$0xf0] }
  0xfe   : > { %v1028_v34 = vpop.f32.mrf.mxu2  ;;  %1521 = vmatpush.bf16.msra.mxu2 %v2642_v59  ;;  %1508 = vmatpush.bf16.msra.mxu1 %v2702_v15  ;;  %v2605_v59 = vld [vmem:[#allocation10] sm:$0xf]  ;;  %v2670_v0 = vor.u32 %v3019_v63, %v2669_v62 }
  0xff   : > { %v1041_v41 = vpop.f32.mrf.mxu3  ;;  %3215 = vxpose.binary.xlu0.c.b16.start.end [1/2] (short) %v1098_v29, %v1095_v20, 128  ;;  %1104 = vst [vmem:[%s3875_s12 + $0x4] sm:$0xf] %v1098_v29  ;;  %v3022_v20 = vld [vmem:[#allocation10 + $0xa4] sm:$0xf]  ;;  %v2615_v29 = vld [vmem:[#allocation10 + $0x18] sm:$0xf0]  ;;  %v2622_v34 = vor.u32 %v3007_v32, %v2621_v31  ;;  %v2606_v61 = vor.u32 %v3003_v60, %v2605_v59 }
 0x100   : > { %1535 = vmatpush.bf16.msra.mxu3 %v2698_v11  ;;  %v2690_v24 = vor.u32 %v3022_v20, %v2687_v23  ;;  %v2618_v30 = vor.u32 %v3004_v27, %v2615_v29  ;;  %v3002_v41 = vld [vmem:[#allocation10 + $0x4] sm:$0xf] }
 0x101   : > { %1495 = vmatpush.bf16.msra.mxu0 %v2638_v9  ;;  %v2610_v45 = vor.u32 %v3002_v41, %v2607_v43 }
 0x102   : > { %1522 = vmatpush.bf16.msra.mxu2 %v2634_v6  ;;  %1509 = vmatpush.bf16.msra.mxu1 %v2694_v28 }
 0x104   : > { %1536 = vmatpush.bf16.msra.mxu3 %v2690_v24 }
 0x105   : > { %1496 = vmatpush.bf16.msra.mxu0 %v2630_v22 }
 0x106   : > { %1523 = vmatpush.bf16.msra.mxu2 %v2626_v17  ;;  %1510 = vmatpush.bf16.msra.mxu1 %v2686_v42 }
 0x108   : > { %1537 = vmatpush.bf16.msra.mxu3 %v2682_v38 }
 0x109   : > { %1497 = vmatpush.bf16.msra.mxu0 %v2622_v34 }
 0x10a   : > { %1524 = vmatpush.bf16.msra.mxu2 %v2618_v30  ;;  %1511 = vmatpush.bf16.msra.mxu1 %v2678_v57 }
 0x10c   : > { %1538 = vmatpush.bf16.msra.mxu3 %v2674_v52 }
 0x10d   : > { %1498 = vmatpush.bf16.msra.mxu0 %v2614_v50 }
 0x10e   : > { %1525 = vmatpush.bf16.msra.mxu2 %v2610_v45  ;;  %1512 = vmatpush.bf16.msra.mxu1 %v2670_v0 }
 0x10f   : > { %1539 = vmatmul.bf16.vlgmr.msra.gmra.mxu3 %v1329_v58 }
 0x111   : > { %1526 = vmatmul.bf16.vlgmr.msra.gmra.mxu2 %v1328_v53  ;;  %1499 = vmatpush.bf16.msra.mxu0 %v2606_v61 }
 0x112   : > { %1513 = vmatmul.bf16.vlgmr.msra.gmra.mxu1 %v1329_v58 }
 0x114   : > { %1500 = vmatmul.bf16.vlgmr.msra.gmra.mxu0 %v1328_v53 }
 0x1ab   : > { %v3216_v1 = vpop.trf.xlu0 }
 0x1ac   : > { %v1157_v2 = vunpack.c.l.b16 %v3216_v1  ;;  %v1158_v3 = vunpack.c.h.b16 %v3216_v1 }
 0x1ae   : > { %v1189_v4 = vpack.c.b16 %v1157_v2, %v1157_v2  ;;  %v1190_v5 = vpack.c.b16 %v1158_v3, %v1158_v3  ;;  %v658_v3 = vperm.slane %v3870_v21, 2 }
 0x1b0   : > { %1254 = vst.msk [vmem:[#allocation2] sm:$0xf] %vm1253_vm0, %v1189_v4  ;;  %v1052_v4 = vpop.f32.mrf.mxu0 }
 0x1b1   : > { %1255 = vst.msk [vmem:[#allocation2 + $0x4] sm:$0xf] %vm1253_vm0, %v1190_v5  ;;  %v659_v5 = vperm.slane %v3870_v21, 3 }
 0x1b3   : > { %v3217_v35 = vpop.trf.xlu0 }
 0x1b4   : > { %v1173_v6 = vunpack.c.l.b16 %v3217_v35  ;;  %v1174_v36 = vunpack.c.h.b16 %v3217_v35  ;;  %v1078_v35 = vpop.f32.mrf.mxu2 }
 0x1b6   : > { %v1205_v7 = vpack.c.b16 %v1173_v6, %v1173_v6  ;;  %v1206_v8 = vpack.c.b16 %v1174_v36, %v1174_v36  ;;  %v1065_v6 = vpop.f32.mrf.mxu1  ;;  %v1091_v36 = vpop.f32.mrf.mxu3 }
 0x1b8   : > { %1270 = vst.msk [vmem:[#allocation2 + $0x40] sm:$0xf] %vm1253_vm0, %v1205_v7  ;;  %v1053_v7 = vadd.f32 %v1052_v4, %v658_v3  ;;  %v1054_v21 = vpop.f32.mrf.mxu0 }
 0x1b9   : > { %1271 = vst.msk [vmem:[#allocation2 + $0x44] sm:$0xf] %vm1253_vm0, %v1206_v8  ;;  %v1079_v8 = vadd.f32 %v1078_v35, %v659_v5  ;;  %v2857_v21 = vld [vmem:[#allocation15 + $0x78] sm:$0xf0] }
 0x1bb   : > { %v3218_v9 = vpop.trf.xlu0 }
 0x1bc   : > { %v1159_v10 = vunpack.c.l.b16 %v3218_v9  ;;  %v1160_v11 = vunpack.c.h.b16 %v3218_v9  ;;  %v1066_v9 = vadd.f32 %v1065_v6, %v1053_v7  ;;  %v1548_v6 = vld [vmem:[%s504_s15] sm:$0xff]  ;;  %s3470_s15 = scalar_lea.hbm %s4021_s10, 16 }
 0x1bd   : > { %vm1549_vm2 = vcmp.eq.f32.partialorder %v1548_v6, 0.0  ;;  %v2825_v6 = vld [vmem:[#allocation15 + $0x38] sm:$0xf0]  ;;  %p3472_p11 = scmp.lt.s32.totalorder %s3470_s15, %s3466_s29 }
 0x1be   : > { %v1191_v12 = vpack.c.b16 %v1159_v10, %v1159_v10  ;;  %v1192_v13 = vpack.c.b16 %v1160_v11, %v1160_v11  ;;  %v1092_v10 = vadd.f32 %v1091_v36, %v1079_v8 }
 0x1bf   : > { %p3473_p12 = por %p3472_p11, %p3471_p10 }
 0x1c0   : > { %1256 = vst.msk [vmem:[#allocation2 + $0x8] sm:$0xf] %vm1253_vm0, %v1191_v12  ;;  %v3042_v5 = vld [vmem:[#allocation2 + $0x40] sm:$0xff] }
 0x1c1   : > { %1257 = vst.msk [vmem:[#allocation2 + $0xc] sm:$0xf] %vm1253_vm0, %v1192_v13  ;;  %p3474_p13 = pnand %p3473_p12, %p3469_p5 }
 0x1c3   : > { %v3219_v14 = vpop.trf.xlu0 }
 0x1c4   : > { %v1175_v15 = vunpack.c.l.b16 %v3219_v14  ;;  %v1176_v16 = vunpack.c.h.b16 %v3219_v14  ;;  %v1096_v14 = vpack.c.bf16 %v1092_v10, %v1066_v9 }
 0x1c6   : > { %v1207_v17 = vpack.c.b16 %v1175_v15, %v1175_v15  ;;  %v1208_v18 = vpack.c.b16 %v1176_v16, %v1176_v16  ;;  %1105 = vst [vmem:[%s3914_s21] sm:$0xf] %v1096_v14 }
 0x1c7   : > { %1107 = vst [vmem:[#allocation3] sm:$0xf] %v1096_v14 }
 0x1c8   : > { %1272 = vst.msk [vmem:[#allocation2 + $0x48] sm:$0xf] %vm1253_vm0, %v1207_v17  ;;  %v1101_v17 = vrot.slane %v1096_v14, 4  ;;  %v2855_v14 = vld [vmem:[#allocation15 + $0x70] sm:$0xf] }
 0x1c9   : > { %1273 = vst.msk [vmem:[#allocation2 + $0x4c] sm:$0xf] %vm1253_vm0, %v1208_v18  ;;  %v1080_v18 = vpop.f32.mrf.mxu2 }
 0x1ca   : > { %1106 = vst [vmem:[%s3914_s21 + $0x4] sm:$0xf] %v1101_v17  ;;  %v2847_v18 = vld [vmem:[#allocation15 + $0x60] sm:$0xf] }
 0x1cb   : > { %v3220_v19 = vpop.trf.xlu0  ;;  %1108 = vst [vmem:[#allocation3 + $0x4] sm:$0xf] %v1101_v17 }
 0x1cc   : > { %v1161_v20 = vunpack.c.l.b16 %v3220_v19  ;;  %v1162_v22 = vunpack.c.h.b16 %v3220_v19  ;;  %v1067_v19 = vpop.f32.mrf.mxu1 }
 0x1cd   : > { %v3063_v19 = vld [vmem:[#allocation15 + $0x64] sm:$0xf0] }
 0x1ce   : > { %v1193_v23 = vpack.c.b16 %v1161_v20, %v1161_v20  ;;  %v1194_v24 = vpack.c.b16 %v1162_v22, %v1162_v22  ;;  %v1093_v20 = vpop.f32.mrf.mxu3 }
 0x1d0   : > { %1258 = vst.msk [vmem:[#allocation2 + $0x10] sm:$0xf] %vm1253_vm0, %v1193_v23  ;;  %v3043_v4 = vld [vmem:[#allocation2 + $0x48] sm:$0xff] }
 0x1d1   : > { %1259 = vst.msk [vmem:[#allocation2 + $0x14] sm:$0xf] %vm1253_vm0, %v1194_v24 }
 0x1d3   : > { %v3221_v25 = vpop.trf.xlu0 }
 0x1d4   : > { %v1177_v26 = vunpack.c.l.b16 %v3221_v25  ;;  %v1178_v27 = vunpack.c.h.b16 %v3221_v25 }
 0x1d6   : > { %v1209_v28 = vpack.c.b16 %v1177_v26, %v1177_v26  ;;  %v1210_v29 = vpack.c.b16 %v1178_v27, %v1178_v27  ;;  %v1501_v27 = vpop.f32.mrf.mxu0 }
 0x1d8   : > { %1274 = vst.msk [vmem:[#allocation2 + $0x50] sm:$0xf] %vm1253_vm0, %v1209_v28  ;;  %v1527_v28 = vpop.f32.mrf.mxu2 }
 0x1d9   : > { %1275 = vst.msk [vmem:[#allocation2 + $0x54] sm:$0xf] %vm1253_vm0, %v1210_v29  ;;  %v1514_v29 = vpop.f32.mrf.mxu1 }
 0x1db   : > { %v3222_v30 = vpop.trf.xlu0 }
 0x1dc   : > { %v1163_v31 = vunpack.c.l.b16 %v3222_v30  ;;  %v1164_v32 = vunpack.c.h.b16 %v3222_v30 }
 0x1de   : > { %v1195_v33 = vpack.c.b16 %v1163_v31, %v1163_v31  ;;  %v1196_v34 = vpack.c.b16 %v1164_v32, %v1164_v32  ;;  %v1540_v31 = vpop.f32.mrf.mxu3 }
 0x1e0   : > { %1260 = vst.msk [vmem:[#allocation2 + $0x18] sm:$0xf] %vm1253_vm0, %v1195_v33 }
 0x1e1   : > { %1261 = vst.msk [vmem:[#allocation2 + $0x1c] sm:$0xf] %vm1253_vm0, %v1196_v34 }
 0x1e3   : > { %v3223_v37 = vpop.trf.xlu0 }
 0x1e4   : > { %v1179_v38 = vunpack.c.l.b16 %v3223_v37  ;;  %v1180_v39 = vunpack.c.h.b16 %v3223_v37 }
 0x1e6   : > { %v1211_v40 = vpack.c.b16 %v1179_v38, %v1179_v38  ;;  %v1212_v41 = vpack.c.b16 %v1180_v39, %v1180_v39  ;;  %v1729_v38 = vld [vmem:[#allocation3] sm:$0xf] }
 0x1e7   : > { %v1736_v39 = vsel %vm1734_vm1, %v1729_v38, 0 }
 0x1e8   : > { %1276 = vst.msk [vmem:[#allocation2 + $0x58] sm:$0xf] %vm1253_vm0, %v1211_v40  ;;  %1745 = vmatpush.bf16.msrb.mxu2 %v1736_v39 }
 0x1e9   : > { %1277 = vst.msk [vmem:[#allocation2 + $0x5c] sm:$0xf] %vm1253_vm0, %v1212_v41  ;;  %v1503_v41 = vpop.f32.mrf.mxu0 }
 0x1eb   : > { %v3224_v42 = vpop.trf.xlu0 }
 0x1ec   : > { %v1165_v43 = vunpack.c.l.b16 %v3224_v42  ;;  %v1166_v44 = vunpack.c.h.b16 %v3224_v42  ;;  %v1730_v42 = vld [vmem:[#allocation3 + $0x4] sm:$0xf] }
 0x1ee   : > { %v1197_v45 = vpack.c.b16 %v1165_v43, %v1165_v43  ;;  %v1198_v46 = vpack.c.b16 %v1166_v44, %v1166_v44  ;;  %v1529_v43 = vpop.f32.mrf.mxu2  ;;  %v1755_v44 = vsel %vm1734_vm1, %v1730_v42, 0 }
 0x1ef   : > { %1764 = vmatpush.bf16.msrb.mxu3 %v1755_v44 }
 0x1f0   : > { %1262 = vst.msk [vmem:[#allocation2 + $0x20] sm:$0xf] %vm1253_vm0, %v1197_v45  ;;  %v1516_v45 = vpop.f32.mrf.mxu1 }
 0x1f1   : > { %1263 = vst.msk [vmem:[#allocation2 + $0x24] sm:$0xf] %vm1253_vm0, %v1198_v46  ;;  %v1542_v46 = vpop.f32.mrf.mxu3 }
 0x1f3   : > { %v3225_v47 = vpop.trf.xlu0 }
 0x1f4   : > { %v1181_v48 = vunpack.c.l.b16 %v3225_v47  ;;  %v1182_v49 = vunpack.c.h.b16 %v3225_v47 }
 0x1f6   : > { %v1213_v50 = vpack.c.b16 %v1181_v48, %v1181_v48  ;;  %v1214_v51 = vpack.c.b16 %v1182_v49, %v1182_v49 }
 0x1f8   : > { %1278 = vst.msk [vmem:[#allocation2 + $0x60] sm:$0xf] %vm1253_vm0, %v1213_v50  ;;  %v3038_v50 = vld [vmem:[#allocation2 + $0x20] sm:$0xff] }
 0x1f9   : > { %1279 = vst.msk [vmem:[#allocation2 + $0x64] sm:$0xf] %vm1253_vm0, %v1214_v51 }
 0x1fb   : > { %v3226_v52 = vpop.trf.xlu0 }
 0x1fc   : > { %v1167_v53 = vunpack.c.l.b16 %v3226_v52  ;;  %v1168_v54 = vunpack.c.h.b16 %v3226_v52  ;;  %v1319_v52 = vld [vmem:[#allocation12] sm:$0x3] }
 0x1fe   : > { %v1199_v55 = vpack.c.b16 %v1167_v53, %v1167_v53  ;;  %v1200_v56 = vpack.c.b16 %v1168_v54, %v1168_v54  ;;  %v3037_v53 = vld [vmem:[#allocation2 + $0x18] sm:$0xff] }
 0x200   : > { %1264 = vst.msk [vmem:[#allocation2 + $0x28] sm:$0xf] %vm1253_vm0, %v1199_v55  ;;  %v1321_v55 = vperm.slane %v1319_v52, 0 }
 0x201   : > { %1265 = vst.msk [vmem:[#allocation2 + $0x2c] sm:$0xf] %vm1253_vm0, %v1200_v56  ;;  %v1322_v56 = vperm.slane %v1319_v52, 1  ;;  %v2831_v52 = vld [vmem:[#allocation15 + $0x40] sm:$0xf] }
 0x203   : > { %v3227_v57 = vpop.trf.xlu0 }
 0x204   : > { %v1183_v58 = vunpack.c.l.b16 %v3227_v57  ;;  %v1184_v59 = vunpack.c.h.b16 %v3227_v57  ;;  %v3036_v57 = vld [vmem:[#allocation2 + $0x10] sm:$0xff] }
 0x206   : > { %v1215_v60 = vpack.c.b16 %v1183_v58, %v1183_v58  ;;  %v1216_v61 = vpack.c.b16 %v1184_v59, %v1184_v59  ;;  %v3046_v58 = vld [vmem:[#allocation2 + $0x60] sm:$0xff]  ;;  %v1502_v59 = vadd.f32 %v1501_v27, %v1321_v55 }
 0x208   : > { %1280 = vst.msk [vmem:[#allocation2 + $0x68] sm:$0xf] %vm1253_vm0, %v1215_v60  ;;  %v3039_v48 = vld [vmem:[#allocation2 + $0x28] sm:$0xff]  ;;  %v1528_v60 = vadd.f32 %v1527_v28, %v1322_v56  ;;  %v3079_v56 = vld [vmem:[#allocation15 + $0xe4] sm:$0xf0] }
 0x209   : > { %1281 = vst.msk [vmem:[#allocation2 + $0x6c] sm:$0xf] %vm1253_vm0, %v1216_v61  ;;  %v3035_v61 = vld [vmem:[#allocation2 + $0x8] sm:$0xff] }
 0x20a   : > { %v2839_v28 = vld [vmem:[#allocation15 + $0x50] sm:$0xf] }
 0x20b   : > { %v3228_v62 = vpop.trf.xlu0 }
 0x20c   : > { %v1169_v63 = vunpack.c.l.b16 %v3228_v62  ;;  %v1170_v0 = vunpack.c.h.b16 %v3228_v62  ;;  %v3045_v62 = vld [vmem:[#allocation2 + $0x58] sm:$0xff] }
 0x20e   : > { %v1201_v1 = vpack.c.b16 %v1169_v63, %v1169_v63  ;;  %v1202_v2 = vpack.c.b16 %v1170_v0, %v1170_v0  ;;  %v1515_v63 = vadd.f32 %v1514_v29, %v1502_v59  ;;  %v1541_v0 = vadd.f32 %v1540_v31, %v1528_v60  ;;  %v3061_v29 = vld [vmem:[#allocation15 + $0x54] sm:$0xf0]  ;;  %v3080_v31 = vld [vmem:[#allocation15 + $0xf4] sm:$0xf] }
 0x20f   : > { %v2840_v38 = vor.u32 %v3061_v29, %v2839_v28  ;;  %v3052_v28 = vld [vmem:[#allocation15 + $0x14] sm:$0xf]  ;;  %v2809_v29 = vld [vmem:[#allocation15 + $0x18] sm:$0xf0] }
 0x210   : > { %1266 = vst.msk [vmem:[#allocation2 + $0x30] sm:$0xf] %vm1253_vm0, %v1201_v1  ;;  %v3047_v54 = vld [vmem:[#allocation2 + $0x68] sm:$0xff]  ;;  %v3034_v1 = vld [vmem:[#allocation2] sm:$0xff]  ;;  %v1544_v3 = vpack.c.bf16 %v1541_v0, %v1515_v63 }
 0x211   : > { %1267 = vst.msk [vmem:[#allocation2 + $0x34] sm:$0xf] %vm1253_vm0, %v1202_v2  ;;  %v3044_v2 = vld [vmem:[#allocation2 + $0x50] sm:$0xff]  ;;  %v2823_v63 = vld [vmem:[#allocation15 + $0x30] sm:$0xf] }
 0x212   : > { %v1546_v35 = vrot.slane %v1544_v3, 4 }
 0x213   : > { %v3229_v11 = vpop.trf.xlu0 }
 0x214   : > { %v1185_v12 = vunpack.c.l.b16 %v3229_v11  ;;  %v1186_v13 = vunpack.c.h.b16 %v3229_v11 }
 0x216   : > { %v1217_v15 = vpack.c.b16 %v1185_v12, %v1185_v12  ;;  %v1218_v16 = vpack.c.b16 %v1186_v13, %v1186_v13 }
 0x218   : > { %1282 = vst.msk [vmem:[#allocation2 + $0x70] sm:$0xf] %vm1253_vm0, %v1217_v15  ;;  %v3040_v47 = vld [vmem:[#allocation2 + $0x30] sm:$0xff] }
 0x219   : > { %1283 = vst.msk [vmem:[#allocation2 + $0x74] sm:$0xf] %vm1253_vm0, %v1218_v16  ;;  %v3065_v15 = vld [vmem:[#allocation15 + $0x74] sm:$0xf0]  ;;  %v3064_v16 = vld [vmem:[#allocation15 + $0x74] sm:$0xf] }
 0x21a   : > { %v2856_v17 = vor.u32 %v3065_v15, %v2855_v14  ;;  %v2860_v20 = vor.u32 %v3064_v16, %v2857_v21  ;;  %v3075_v14 = vld [vmem:[#allocation15 + $0xc4] sm:$0xf0]  ;;  %v3054_v15 = vld [vmem:[#allocation15 + $0x24] sm:$0xf]  ;;  %v2817_v16 = vld [vmem:[#allocation15 + $0x28] sm:$0xf0] }
 0x21b   : > { %v3230_v22 = vpop.trf.xlu0  ;;  %v2820_v21 = vor.u32 %v3054_v15, %v2817_v16 }
 0x21c   : > { %v1171_v23 = vunpack.c.l.b16 %v3230_v22  ;;  %v1172_v24 = vunpack.c.h.b16 %v3230_v22  ;;  %v3062_v22 = vld [vmem:[#allocation15 + $0x64] sm:$0xf]  ;;  %1974 = vmatpush.bf16.msra.mxu2 %v2856_v17 }
 0x21e   : > { %v1203_v25 = vpack.c.b16 %v1171_v23, %v1171_v23  ;;  %v1204_v26 = vpack.c.b16 %v1172_v24, %v1172_v24  ;;  %v2849_v23 = vld [vmem:[#allocation15 + $0x68] sm:$0xf0]  ;;  %v2848_v24 = vor.u32 %v3063_v19, %v2847_v18  ;;  %v3074_v18 = vld [vmem:[#allocation15 + $0xc4] sm:$0xf] }
 0x21f   : > { %v2852_v27 = vor.u32 %v3062_v22, %v2849_v23  ;;  %v2897_v19 = vld [vmem:[#allocation15 + $0xc8] sm:$0xf0]  ;;  %v3053_v23 = vld [vmem:[#allocation15 + $0x14] sm:$0xf0] }
 0x220   : > { %1268 = vst.msk [vmem:[#allocation2 + $0x38] sm:$0xf] %vm1253_vm0, %v1203_v25  ;;  %v3048_v51 = vld [vmem:[#allocation2 + $0x70] sm:$0xff]  ;;  %v2919_v25 = vld [vmem:[#allocation15 + $0xf0] sm:$0xf]  ;;  %1975 = vmatpush.bf16.msra.mxu2 %v2848_v24  ;;  %v2900_v22 = vor.u32 %v3074_v18, %v2897_v19 }
 0x221   : > { %1269 = vst.msk [vmem:[#allocation2 + $0x3c] sm:$0xf] %vm1253_vm0, %v1204_v26  ;;  %v3081_v26 = vld [vmem:[#allocation15 + $0xf4] sm:$0xf0]  ;;  %v2887_v24 = vld [vmem:[#allocation15 + $0xb0] sm:$0xf] }
 0x223   : > { %v3231_v30 = vpop.trf.xlu0 }
 0x224   : > { %v1187_v32 = vunpack.c.l.b16 %v3231_v30  ;;  %v1188_v33 = vunpack.c.h.b16 %v3231_v30  ;;  %v2920_v30 = vor.u32 %v3081_v26, %v2919_v25  ;;  %1976 = vmatpush.bf16.msra.mxu2 %v2840_v38  ;;  %v3073_v25 = vld [vmem:[#allocation15 + $0xb4] sm:$0xf0]  ;;  %v2879_v38 = vld [vmem:[#allocation15 + $0xa0] sm:$0xf] }
 0x226   : > { %v1219_v34 = vpack.c.b16 %v1187_v32, %v1187_v32  ;;  %v1220_v37 = vpack.c.b16 %v1188_v33, %v1188_v33  ;;  %v3060_v32 = vld [vmem:[#allocation15 + $0x54] sm:$0xf]  ;;  %v2841_v33 = vld [vmem:[#allocation15 + $0x58] sm:$0xf0]  ;;  %1987 = vmatpush.bf16.msra.mxu3 %v2920_v30 }
 0x227   : > { %v2844_v39 = vor.u32 %v3060_v32, %v2841_v33  ;;  %v3072_v30 = vld [vmem:[#allocation15 + $0xb4] sm:$0xf]  ;;  %v2889_v32 = vld [vmem:[#allocation15 + $0xb8] sm:$0xf0] }
 0x228   : > { %1284 = vst.msk [vmem:[#allocation2 + $0x78] sm:$0xf] %vm1253_vm0, %v1219_v34  ;;  %v3041_v40 = vld [vmem:[#allocation2 + $0x38] sm:$0xff]  ;;  %v2892_v33 = vor.u32 %v3072_v30, %v2889_v32 }
 0x229   : > { %1285 = vst.msk [vmem:[#allocation2 + $0x7c] sm:$0xf] %vm1253_vm0, %v1220_v37  ;;  %1630 = vmatpush.bf16.msrb.mxu0 %v3041_v40  ;;  %v2921_v34 = vld [vmem:[#allocation15 + $0xf8] sm:$0xf0] }
 0x22a   : > { %v2924_v37 = vor.u32 %v3080_v31, %v2921_v34  ;;  %v2812_v31 = vor.u32 %v3052_v28, %v2809_v29  ;;  %v2799_v34 = vld [vmem:[#allocation15] sm:$0xf] }
 0x22d   : > { %1631 = vmatpush.bf16.msrb.mxu0 %v3040_v47 }
 0x230   : > { %v3049_v49 = vld [vmem:[#allocation2 + $0x78] sm:$0xff] }
 0x231   : > { %1632 = vmatpush.bf16.msrb.mxu0 %v3039_v48  ;;  %1691 = vmatpush.bf16.msrb.mxu1 %v3049_v49 }
 0x235   : > { %1633 = vmatpush.bf16.msrb.mxu0 %v3038_v50  ;;  %1692 = vmatpush.bf16.msrb.mxu1 %v3048_v51 }
 0x239   : > { %1634 = vmatpush.bf16.msrb.mxu0 %v3037_v53  ;;  %1693 = vmatpush.bf16.msrb.mxu1 %v3047_v54  ;;  %v3059_v53 = vld [vmem:[#allocation15 + $0x44] sm:$0xf0]  ;;  %v2911_v54 = vld [vmem:[#allocation15 + $0xe0] sm:$0xf] }
 0x23a   : > { %v2832_v55 = vor.u32 %v3059_v53, %v2831_v52  ;;  %v2912_v59 = vor.u32 %v3079_v56, %v2911_v54  ;;  %v2873_v52 = vld [vmem:[#allocation15 + $0x98] sm:$0xf0]  ;;  %v2863_v54 = vld [vmem:[#allocation15 + $0x80] sm:$0xf]  ;;  %v3066_v56 = vld [vmem:[#allocation15 + $0x84] sm:$0xf] }
 0x23c   : > { %1977 = vmatpush.bf16.msra.mxu2 %v2832_v55  ;;  %1988 = vmatpush.bf16.msra.mxu3 %v2912_v59  ;;  %v3067_v55 = vld [vmem:[#allocation15 + $0x84] sm:$0xf0] }
 0x23d   : > { %1635 = vmatpush.bf16.msrb.mxu0 %v3036_v57  ;;  %1694 = vmatpush.bf16.msrb.mxu1 %v3046_v58  ;;  %v3058_v57 = vld [vmem:[#allocation15 + $0x44] sm:$0xf]  ;;  %v2833_v58 = vld [vmem:[#allocation15 + $0x48] sm:$0xf0] }
 0x23e   : > { %v2836_v60 = vor.u32 %v3058_v57, %v2833_v58  ;;  %v2864_v57 = vor.u32 %v3067_v55, %v2863_v54  ;;  %v2865_v58 = vld [vmem:[#allocation15 + $0x88] sm:$0xf0] }
 0x23f   : > { %v2868_v59 = vor.u32 %v3066_v56, %v2865_v58 }
 0x241   : > { %1636 = vmatpush.bf16.msrb.mxu0 %v3035_v61  ;;  %1695 = vmatpush.bf16.msrb.mxu1 %v3045_v62  ;;  %v3078_v61 = vld [vmem:[#allocation15 + $0xe4] sm:$0xf]  ;;  %v2913_v62 = vld [vmem:[#allocation15 + $0xe8] sm:$0xf0] }
 0x242   : > { %v2916_v0 = vor.u32 %v3078_v61, %v2913_v62 }
 0x245   : > { %1637 = vmatpush.bf16.msrb.mxu0 %v3034_v1  ;;  %1696 = vmatpush.bf16.msrb.mxu1 %v3044_v2  ;;  %v3057_v1 = vld [vmem:[#allocation15 + $0x34] sm:$0xf0]  ;;  %v2903_v2 = vld [vmem:[#allocation15 + $0xd0] sm:$0xf] }
 0x248   : > { %1638 = vmatmul.bf16.vlgmr.msrb.gmra.mxu0 %v1544_v3  ;;  %v3077_v3 = vld [vmem:[#allocation15 + $0xd4] sm:$0xf0] }
 0x249   : > { %1697 = vmatpush.bf16.msrb.mxu1 %v3043_v4  ;;  %2000 = vmatpush.bf16.msra.mxu0 %v2860_v20  ;;  %v2824_v4 = vor.u32 %v3057_v1, %v2823_v63  ;;  %v2807_v20 = vld [vmem:[#allocation15 + $0x10] sm:$0xf] }
 0x24a   : > { %v2808_v26 = vor.u32 %v3053_v23, %v2807_v20 }
 0x24b   : > { %1978 = vmatpush.bf16.msra.mxu2 %v2824_v4 }
 0x24d   : > { %1698 = vmatpush.bf16.msrb.mxu1 %v3042_v5  ;;  %2001 = vmatpush.bf16.msra.mxu0 %v2852_v27  ;;  %v2904_v5 = vor.u32 %v3077_v3, %v2903_v2  ;;  %v2888_v27 = vor.u32 %v3073_v25, %v2887_v24 }
 0x24f   : > { %1989 = vmatpush.bf16.msra.mxu3 %v2904_v5 }
 0x250   : > { %1699 = vmatmul.bf16.vlgmr.msrb.gmra.mxu1 %v1546_v35  ;;  %v3056_v35 = vld [vmem:[#allocation15 + $0x34] sm:$0xf] }
 0x251   : > { %2013 = vmatpush.bf16.msra.mxu1 %v2924_v37  ;;  %2002 = vmatpush.bf16.msra.mxu0 %v2844_v39  ;;  %v3051_v37 = vld [vmem:[#allocation15 + $0x4] sm:$0xf0] }
 0x252   : > { %v2800_v39 = vor.u32 %v3051_v37, %v2799_v34 }
 0x255   : > { %2003 = vmatpush.bf16.msra.mxu0 %v2836_v60  ;;  %2014 = vmatpush.bf16.msra.mxu1 %v2916_v0 }
 0x2c5   : > { %v1639_v36 = vpop.f32.mrf.mxu0 }
 0x2c6   : > { %v1706_v7 = vsel %vm1549_vm2, -1e+20, %v1639_v36  ;;  %v3076_v36 = vld [vmem:[#allocation15 + $0xd4] sm:$0xf] }
 0x2c7   : > { %v1709_v8 = vsel %vm1708_vm3, %v1706_v7, -inf }
 0x2c8   : > { %1710 = vmax.xlane.f32.xlu0 %v1709_v8  ;;  %v2905_v8 = vld [vmem:[#allocation15 + $0xd8] sm:$0xf0] }
 0x2cd   : > { %v1641_v9 = vpop.f32.mrf.mxu0  ;;  %v1700_v10 = vpop.f32.mrf.mxu1 }
 0x2ce   : > { %v1707_v11 = vsel %vm1549_vm2, -1e+20, %v1700_v10  ;;  %v2908_v9 = vor.u32 %v3076_v36, %v2905_v8  ;;  %v2815_v10 = vld [vmem:[#allocation15 + $0x20] sm:$0xf] }
 0x2cf   : > { %v1712_v12 = vsel %vm1708_vm3, %v1707_v11, -inf }
 0x2d0   : > { %1713 = vmax.xlane.f32.xlu1 %v1712_v12  ;;  %v2895_v12 = vld [vmem:[#allocation15 + $0xc0] sm:$0xf]  ;;  %2015 = vmatpush.bf16.msra.mxu1 %v2908_v9 }
 0x2d1   : > { %v2896_v17 = vor.u32 %v3075_v14, %v2895_v12 }
 0x2d3   : > { %1990 = vmatpush.bf16.msra.mxu3 %v2896_v17 }
 0x2d4   : > { %2016 = vmatpush.bf16.msra.mxu1 %v2900_v22 }
 0x2d5   : > { %v1702_v13 = vpop.f32.mrf.mxu1 }
 0x2d7   : > { %1991 = vmatpush.bf16.msra.mxu3 %v2888_v27 }
 0x2d8   : > { %2017 = vmatpush.bf16.msra.mxu1 %v2892_v33 }
 0x33b   : > { %v1711_v40 = vpop.xlane.xlu0 %1710 }
 0x33c   : > { %v1715_v41 = vsub.f32 %v1706_v7, %v1711_v40  ;;  %v2828_v7 = vor.u32 %v3056_v35, %v2825_v6  ;;  %v3071_v40 = vld [vmem:[#allocation15 + $0xa4] sm:$0xf0] }
 0x33e   : > { %v1717_v42 = vmul.f32 1.442695, %v1715_v41  ;;  %2004 = vmatpush.bf16.msra.mxu0 %v2828_v7  ;;  %v3050_v41 = vld [vmem:[#allocation15 + $0x4] sm:$0xf] }
 0x340   : > { %3232 = vpow2.f32 %v1717_v42  ;;  %v2801_v42 = vld [vmem:[#allocation15 + $0x8] sm:$0xf0] }
 0x342   : > { %2005 = vmatpush.bf16.msra.mxu0 %v2820_v21 }
 0x343   : > { %v1714_v43 = vpop.xlane.xlu1 %1713 }
 0x344   : > { %v1716_v44 = vsub.f32 %v1707_v11, %v1714_v43  ;;  %v3055_v11 = vld [vmem:[#allocation15 + $0x24] sm:$0xf0]  ;;  %v2880_v43 = vor.u32 %v3071_v40, %v2879_v38 }
 0x345   : > { %v2816_v13 = vor.u32 %v3055_v11, %v2815_v10 }
 0x346   : > { %v3233_v45 = vpop.eup %3232  ;;  %v1719_v46 = vmul.f32 1.442695, %v1716_v44  ;;  %2006 = vmatpush.bf16.msra.mxu0 %v2812_v31  ;;  %v2804_v44 = vor.u32 %v3050_v41, %v2801_v42  ;;  %1992 = vmatpush.bf16.msra.mxu3 %v2880_v43 }
 0x347   : > { %v1727_v47 = vpack.c.bf16 %v3233_v45, %v3233_v45  ;;  %v1721_v48 = vsel %vm1708_vm3, %v3233_v45, 0.0  ;;  %1979 = vmatpush.bf16.msra.mxu2 %v2816_v13  ;;  %v3070_v45 = vld [vmem:[#allocation15 + $0xa4] sm:$0xf] }
 0x348   : > { %3234 = vpow2.f32 %v1719_v46  ;;  %1722 = vadd.xlane.f32.xlu1 %v1721_v48  ;;  %v2881_v46 = vld [vmem:[#allocation15 + $0xa8] sm:$0xf0]  ;;  %v2871_v48 = vld [vmem:[#allocation15 + $0x90] sm:$0xf] }
 0x349   : > { %2795 = vmatmul.msk.bf16.vlgmr.msrb.gmra.mxu2 %vm1708_vm3, %v1727_v47  ;;  %v2884_v47 = vor.u32 %v3070_v45, %v2881_v46 }
 0x34a   : > { %2007 = vmatpush.bf16.msra.mxu0 %v2804_v44 }
 0x34b   : > { %1980 = vmatpush.bf16.msra.mxu2 %v2808_v26  ;;  %2018 = vmatpush.bf16.msra.mxu1 %v2884_v47 }
 0x34e   : > { %v3235_v49 = vpop.eup %3234 }
 0x34f   : > { %v1728_v50 = vpack.c.bf16 %v3235_v49, %v3235_v49  ;;  %v1724_v51 = vsel %vm1708_vm3, %v3235_v49, 0.0  ;;  %1981 = vmatpush.bf16.msra.mxu2 %v2800_v39  ;;  %v3069_v49 = vld [vmem:[#allocation15 + $0x94] sm:$0xf0] }
 0x350   : > { %1725 = vadd.xlane.f32.xlu2 %v1724_v51  ;;  %v2872_v51 = vor.u32 %v3069_v49, %v2871_v48 }
 0x351   : > { %2796 = vmatmul.msk.bf16.vlgmr.msrb.gmra.mxu3 %vm1708_vm3, %v1728_v50  ;;  %v3068_v50 = vld [vmem:[#allocation15 + $0x94] sm:$0xf] }
 0x352   : > { %v2876_v53 = vor.u32 %v3068_v50, %v2873_v52  ;;  %1993 = vmatpush.bf16.msra.mxu3 %v2872_v51 }
 0x354   : > { %2019 = vmatpush.bf16.msra.mxu1 %v2876_v53 }
 0x356   : > { %1994 = vmatpush.bf16.msra.mxu3 %v2864_v57 }
 0x358   : > { %2020 = vmatpush.bf16.msra.mxu1 %v2868_v59 }
 0x3bb   : > { %v1723_v60 = vpop.xlane.xlu1 %1722 }
 0x3bc   : > { %3236 = vrcp.f32 %v1723_v60 }
 0x3c2   : > { %v3237_v62 = vpop.eup %3236 }
 0x3c3   : > { %v1726_v61 = vpop.xlane.xlu2 %1725 }
 0x3c4   : > { %3238 = vrcp.f32 %v1726_v61 }
 0x3ca   : > { %v3239_v2 = vpop.eup %3238 }
 0x3cc   : > { %v1747_v63 = vpop.f32.mrf.mxu2 }
 0x3cd   : > { %v1772_v0 = vmul.f32 %v3237_v62, %v1747_v63 }
 0x3cf   : > { %v1774_v1 = vpack.c.bf16 %v1772_v0, %v1772_v0 }
 0x3d1   : > { %1982 = vmatmul.bf16.vlgmr.msra.gmra.mxu2 %v1774_v1  ;;  %2008 = vmatmul.bf16.vlgmr.msra.gmra.mxu0 %v1774_v1 }
 0x3d4   : > { %v1749_v3 = vpop.f32.mrf.mxu2  ;;  %v1766_v4 = vpop.f32.mrf.mxu3 }
 0x3d5   : > { %v1773_v5 = vmul.f32 %v3239_v2, %v1766_v4 }
 0x3d7   : > { %v1775_v35 = vpack.c.bf16 %v1773_v5, %v1773_v5 }
 0x3d9   : > { %1995 = vmatmul.bf16.vlgmr.msra.gmra.mxu3 %v1775_v35  ;;  %2021 = vmatmul.bf16.vlgmr.msra.gmra.mxu1 %v1775_v35 }
 0x3dc   : > { %v1768_v6 = vpop.f32.mrf.mxu3 }
 0x3dd   : > { %3477 = shalt.err (!%p3474_p13)
}
 0x3de   : > { %s3614_s23 = smov 64   ;;  %s3615_s0 = smov 4  }
 0x3df   : > { %3108 = dma.vmem_to_hbm [thread:$0]  (%p3761_p2), %s2069_s22, 128, %s2071_s28, %s3943_s4, %s3614_s23, %s3614_s23, %s3615_s0  }
 0x3e0   : > { %s2087_s12 = sshll.u32 %s2084_s30, 4  ;;  %s3498_s3 = scalar_lea.hbm %s4022_s11, 16  ;;  %s2088_s12 = int_to_ptr.hbm [resolvable:$true] %s2087_s12 }
 0x3e1   : > { %s3492_s21 = sshra.s32 %s2088_s12, 4  ;;  %s3493_s21 = int_to_ptr.hbm [resolvable:$true] %s3492_s21 }
 0x3e2   : > { %s3494_s1 = scalar_lea.hbm %s3493_s21, 8  ;;  %p3499_p8 = scmp.lt.s32.totalorder %s3493_s21, %s4022_s11 }
 0x3e3   : > { %p3495_p0 = scmp.ne.s32.totalorder %s3493_s21, %s3494_s1  ;;  %p3500_p1 = scmp.lt.s32.totalorder %s3498_s3, %s3494_s1 }
 0x3e5   : > { %p3496_p4 = pnand %p3495_p0, %p3761_p2  ;;  %p3501_p3 = por %p3500_p1, %p3499_p8 }
 0x3e7   : > { %p3497_p9 = pneg %p3496_p4 }
 0x3e9   : > { %p3502_p5 = pnand %p3501_p3, %p3497_p9 }
 0x3eb   : > { %3505 = shalt.err (!%p3502_p5)
}
 0x3ec   : > { %3109 = dma.vmem_to_hbm [thread:$0]  (%p3761_p2), %s2086_s26, 128, %s2088_s12, %s3943_s4, %s3614_s23, %s3614_s23, %s3615_s0  }
 0x3ed   : > { %s4064_s30 = sld [smem:[#allocation38_spill]]  ;;  %s2344_s7 = sshll.u32 %s3829_s25, 4 }
 0x3ee   : > { %s3082_s29 = sshll.u32 %s3596_s20, 4  ;;  %s4065_s15 = sld [smem:[#allocation39_spill]] }
 0x3ef   : > { %s569_s26 = scalar_lea.vmem [#allocation16], %s2344_s7  ;;  %s2029_s20 = scalar_lea.sflag [#allocation6], %s3829_s25 }
 0x3f0   : > { %s2054_s4 = sshll.u32 %s569_s26, 4  ;;  %s2055_s4 = int_to_ptr.vmem [resolvable:$true] %s2054_s4 }
 0x3f3   : > { %v1808_v36 = vld [vmem:[%s4064_s30] sm:$0x3] }
 0x3f4   : > { %v1811_v8 = vperm.slane %v1808_v36, 1  ;;  %v1810_v13 = vperm.slane %v1808_v36, 0  ;;  %s2052_s16 = scalar_lea.hbm %s4065_s15, %s3082_s29  ;;  %s3526_s1 = scalar_lea.hbm %s4065_s15, 32 }
 0x3f5   : > { %s2056_s14 = sshll.u32 %s2052_s16, 4  ;;  %s2057_s14 = int_to_ptr.hbm [resolvable:$true] %s2056_s14 }
 0x3f6   : > { %s3520_s23 = sshra.s32 %s2057_s14, 4  ;;  %s3521_s23 = int_to_ptr.hbm [resolvable:$true] %s3520_s23 }
 0x3f7   : > { %s3522_s0 = scalar_lea.hbm %s3521_s23, 16  ;;  %p3527_p13 = scmp.lt.s32.totalorder %s3521_s23, %s4065_s15 }
 0x3f8   : > { %p3523_p10 = scmp.ne.s32.totalorder %s3521_s23, %s3522_s0  ;;  %p3528_p0 = scmp.lt.s32.totalorder %s3526_s1, %s3522_s0 }
 0x3fa   : > { %p3524_p11 = pnand %p3523_p10, %p3761_p2  ;;  %p3529_p4 = por %p3528_p0, %p3527_p13 }
 0x3fc   : > { %p3525_p12 = pneg %p3524_p11 }
 0x3fe   : > { %p3530_p9 = pnand %p3529_p4, %p3525_p12 }
 0x44e   : > { %v2009_v7 = vpop.f32.mrf.mxu0 }
 0x44f   : > { %v2010_v10 = vadd.f32 %v2009_v7, %v1811_v8 }
 0x454   : > { %v1983_v9 = vpop.f32.mrf.mxu2 }
 0x455   : > { %v1984_v15 = vadd.f32 %v1983_v9, %v1810_v13 }
 0x456   : > { %v2011_v11 = vpop.f32.mrf.mxu0  ;;  %v2022_v12 = vpop.f32.mrf.mxu1 }
 0x457   : > { %v2023_v14 = vadd.f32 %v2022_v12, %v2010_v10 }
 0x459   : > { %2027 = vst [vmem:[%s569_s26 + $0x8] sm:$0xff] %v2023_v14 }
 0x45c   : > { %v1985_v16 = vpop.f32.mrf.mxu2  ;;  %v1996_v17 = vpop.f32.mrf.mxu3 }
 0x45d   : > { %v1997_v21 = vadd.f32 %v1996_v17, %v1984_v15 }
 0x45e   : > { %v2024_v18 = vpop.f32.mrf.mxu1 }
 0x45f   : > { %2026 = vst [vmem:[%s569_s26] sm:$0xff] %v1997_v21 }
 0x460   : > { %3533 = shalt.err (!%p3530_p9)
}
 0x461   : > { %3107 = dma.vmem_to_hbm [thread:$0]  (%p3761_p2), %s2055_s4, 256, %s2057_s14, %s2029_s20  }
 0x464   : > { %v1998_v19 = vpop.f32.mrf.mxu3 }
 0x465 PF: > { %s4066_s25 = sld [smem:[#allocation26_spill]]  ;;  %p3137_p8 = pnand %p2327_p6, %p3770_p7 }
 0x466   : > { %s4068_s5 = sld [smem:[#allocation28_spill]] }
 0x467   : > { %p3138_p1 = pneg %p3137_p8 }
 0x46b   : > { %s2102_s17 = sand.u32 1, %s4066_s25  }
 0x46c   : > { %s2103_s22 = scalar_lea.sflag [#allocation6], %s2102_s17 }
 0x46d   : > { %3575 = dma.done.wait (%p3138_p1), %s2103_s22, 256  }
 0x46e   : > { %3577 = vsyncadd (%p3138_p1), %s2103_s22, 4294967040  ;;  %s4069_s28 = sadd.s32 4294967294, %s4068_s5  }
 0x46f   : > { %s2112_s30 = sand.u32 1, %s4069_s28  }
 0x470   : > { %s2113_s7 = scalar_lea.sflag [#allocation18], %s2112_s30 }
 0x471   : > { %3579 = dma.done.wait (%p3138_p1), %s2113_s7, 256  }
 0x472   : > { %3581 = vsyncadd (%p3138_p1), %s2113_s7, 4294967040  ;;  %s36_s22 = sadd.s32 1, %s4068_s5   ;;  %s4070_s24 = sld [smem:[#allocation30_spill]] }
 0x473   : > { %p33_p2 = scmp.ge.s32.totalorder %s36_s22, 4   ;;  %s4071_s20 = sld [smem:[#allocation27_spill]] }
 0x474   : > { %s4072_s21 = sld [smem:[#allocation29_spill]]  ;;  %s4073_s17 = smov %s3588_s18 }
 0x475   : > { %s4074_s18 = smov %s3592_s19  ;;  %35 = sbr.rel (!%p33_p2) target bundleno = 21 (0x15), region = 177 }
 0x478   : > { %s4075_s19 = smov %s4070_s24 }
 0x47a   :  { %2129 = vsyncpa [#allocation5], 1 }
 0x47b   :  { %2131 = vsyncpa [#allocation5 + $0x1], 1 }
 0x47c   :  { %2132 = vsyncpa [#allocation8], 1 }
 0x47d   :  { %2134 = vsyncpa [#allocation8 + $0x1], 1 }
 0x47e   :  { %2135 = vsyncpa [#allocation11], 1 }
 0x47f   :  { %2136 = vsyncpa [#allocation14], 1 }
 0x480   :  { %2137 = vsyncpa [#allocation6], 1 }
 0x481   :  { %2139 = vsyncpa [#allocation6 + $0x1], 1 }
 0x482   :  { %2140 = vsyncpa [#allocation18], 1 }
 0x483   :  { %2142 = vsyncpa [#allocation18 + $0x1], 1 }

</bundles_post_ra>
